<compile_context>
chip_gen: v7x
topology: tpu7x:2x2x1
jax: 0.10.0
libtpu: 0.0.40
codegen_flags: <defaults>
</compile_context>

<pallas_src>
import math
import numpy as np

import jax
import jax.numpy as jnp
from jax import lax
from jax.experimental import pallas as pl
from jax.experimental.pallas import tpu as pltpu

# ----------------------------- configuration --------------------------------
EMB = 32
HEADS = 4
HEAD_DIM = EMB // HEADS
FWD_EXP = 4
HIDDEN = FWD_EXP * EMB          # 128
SEQ = 8                         # graph-token sequence length
NEIGH = 8                       # number of neighbour embeddings
HS = HEADS * SEQ                # 32 rows of the head-stacked K/V layout
EPS = 1e-5                      # nn.LayerNorm default
SCALE = math.sqrt(float(HEAD_DIM))
INV_SQRT2 = 1.0 / math.sqrt(2.0)

DATA_ROWS = SEQ + NEIGH + 1     # x_graph rows + x_neigh rows + ent row
PACK_COLS = 128                 # lane width of the packed parameter arrays

# -------- packed-parameter layouts (shared by wrapper and kernel) ------------
_W_LAYOUT = [                   # (name, rows, cols)  with cols <= PACK_COLS
    ("w_qkv1", EMB, 3 * EMB),       # MHA1 fused Q|K|V projection (scale folded into Q)
    ("wp1",    EMB, EMB),           # MHA1 output projection
    ("w1n",    EMB, EMB),           # NeighAttention W1
    ("w2n",    2 * EMB, 2 * EMB),   # NeighAttention W2
    ("w3n",    2 * EMB, EMB),       # NeighAttention W3
    ("w_qv2",  EMB, 2 * EMB),       # MHA2 fused Q|V projection (scale folded into Q)
    ("wk2",    EMB, EMB),           # MHA2 K projection
    ("wp2",    EMB, EMB),           # MHA2 output projection
    ("w1f",    EMB, HIDDEN),        # FF first linear
    ("w2f",    HIDDEN, EMB),        # FF second linear
    ("m_he",   HS, EMB),            # head block-diag mask: row//S == col//Dh
    ("bsum",   HS, HS),             # per-head softmax-sum broadcast matrix
]
_W_OFF = {}
_r = 0
for _name, _rows, _cols in _W_LAYOUT:
    _W_OFF[_name] = (_r, _rows, _cols)
    _r += _rows
W_ROWS = _r

_V_LAYOUT = [                   # (name, width) -- one row of the vector pack each
    ("ln1_g", EMB), ("ln1_b", EMB),
    ("b_qkv1", 3 * EMB), ("bp1", EMB),
    ("ln2_g", EMB), ("ln2_b", EMB),
    ("b1n", EMB), ("b2n", 2 * EMB), ("b3n", EMB),
    ("b_qv2", 2 * EMB), ("bk2", EMB), ("bp2", EMB),
    ("ln3_g", EMB), ("ln3_b", EMB),
    ("b1f", HIDDEN), ("b2f", EMB),
]
_V_OFF = {name: (i, w) for i, (name, w) in enumerate(_V_LAYOUT)}
V_ROWS = len(_V_LAYOUT)


# --------------------------------- kernel ------------------------------------
def decoder_block_kernel(data_ref, w_ref, vec_ref, o_ref):
    E, S, Dh, H = EMB, SEQ, HEAD_DIM, HEADS

    def W(name):
        r0, rr, cc = _W_OFF[name]
        return w_ref[r0:r0 + rr, 0:cc]

    def V(name):
        i, cc = _V_OFF[name]
        return vec_ref[i:i + 1, 0:cc]              # (1, cc), broadcasts over rows

    x_graph = data_ref[0:S, :]                     # (S, E)
    x_neigh = data_ref[S:S + NEIGH, :]             # (N, E)
    ent = data_ref[S + NEIGH:S + NEIGH + 1, :]     # (1, E)

    m_he = W("m_he")                               # (H*S, E)
    bsum = W("bsum")                               # (H*S, H*S)

    def layer_norm(x, g, b):
        mu = jnp.mean(x, axis=-1, keepdims=True)
        var = jnp.mean((x - mu) * (x - mu), axis=-1, keepdims=True)
        return (x - mu) * lax.rsqrt(var + EPS) * g + b

    def softmax_last(z):
        z = z - jnp.max(z, axis=-1, keepdims=True)
        ez = jnp.exp(z)
        return ez * pl.reciprocal(jnp.sum(ez, axis=-1, keepdims=True), approx=True)

    def bd_rows(m):
        # (S, E) -> (H*S, E): row h*S+t keeps m[t] only on head h's columns.
        return jnp.concatenate([m] * H, axis=0) * m_he

    def attention_core(q, k, v, wp, bp):
        # q, k, v: (S, E), heads along columns; 1/sqrt(Dh) already folded into q.
        kbd = bd_rows(k)                           # (H*S, E)
        vbd = bd_rows(v)                           # (H*S, E)
        # energy[s, h*S + t] = q_h[s] . k_h[t]   (all heads in one matmul)
        energy = lax.dot_general(q, kbd, (((1,), (1,)), ((), ())),
                                 preferred_element_type=jnp.float32)   # (S, H*S)
        # subtracting the row max is exact for per-head softmax (constant per block)
        energy = energy - jnp.max(energy, axis=-1, keepdims=True)
        p = jnp.exp(energy)
        denom = jnp.dot(p, bsum, preferred_element_type=jnp.float32)   # per-head sums, broadcast
        att = p * pl.reciprocal(denom, approx=True)
        out = jnp.dot(att, vbd, preferred_element_type=jnp.float32)    # (S, E), heads concatenated
        return jnp.dot(out, wp, preferred_element_type=jnp.float32) + bp

    # ---- 1. self-attention ---------------------------------------------------
    x1 = layer_norm(x_graph, V("ln1_g"), V("ln1_b"))
    qkv = jnp.dot(x1, W("w_qkv1"), preferred_element_type=jnp.float32) + V("b_qkv1")   # (S, 3E)
    att1 = attention_core(qkv[:, 0:E], qkv[:, E:2 * E], qkv[:, 2 * E:3 * E],
                          W("wp1"), V("bp1"))
    x_res1 = att1 + x_graph                        # drop1 is identity (p=0)

    # ---- 2. NeighAttention (graphsage) + cross-attention -----------------------
    x2 = layer_norm(x_res1, V("ln2_g"), V("ln2_b"))
    wneigh = jnp.dot(x_neigh, W("w1n"), preferred_element_type=jnp.float32) + V("b1n")  # (N, E)
    # mean over neighbours as a 1xN matmul
    mean_row = jnp.full((1, NEIGH), 1.0 / NEIGH, dtype=jnp.float32)
    agg = jnp.dot(mean_row, wneigh, preferred_element_type=jnp.float32)                 # (1, E)
    # concat([agg, ent]) @ W2 computed as a split matmul (avoids a lane concat)
    w2n = W("w2n")                                                                      # (2E, 2E)
    z2 = (jnp.dot(agg, w2n[0:E, :], preferred_element_type=jnp.float32) +
          jnp.dot(ent, w2n[E:2 * E, :], preferred_element_type=jnp.float32) + V("b2n"))
    c = softmax_last(z2)                                                                # (1, 2E)
    rep = jnp.broadcast_to(c, (S, 2 * E))          # the module's .repeat over the sequence
    neigh_att = softmax_last(
        jnp.dot(rep, W("w3n"), preferred_element_type=jnp.float32) + V("b3n"))          # (S, E)

    qv = jnp.dot(x2, W("w_qv2"), preferred_element_type=jnp.float32) + V("b_qv2")       # (S, 2E)
    k2 = jnp.dot(neigh_att, W("wk2"), preferred_element_type=jnp.float32) + V("bk2")    # (S, E)
    att2 = attention_core(qv[:, 0:E], k2, qv[:, E:2 * E], W("wp2"), V("bp2"))
    x_res2 = att2 + x_res1                         # drop1 (reused) is identity

    # ---- 3. feed-forward -------------------------------------------------------
    x3 = layer_norm(x_res2, V("ln3_g"), V("ln3_b"))
    h = jnp.dot(x3, W("w1f"), preferred_element_type=jnp.float32) + V("b1f")            # (S, HID)
    h = 0.5 * h * (1.0 + lax.erf(h * INV_SQRT2))   # exact-erf GELU (torch default)
    ff = jnp.dot(h, W("w2f"), preferred_element_type=jnp.float32) + V("b2f")            # (S, E)

    o_ref[...] = ff + x_res2                       # drop3 is identity


# -------------------------------- wrapper -------------------------------------
def _pack_weights(p):
    inv_scale = 1.0 / SCALE
    m1, m2, gs, ff = p["mha1"], p["mha2"], p["gs"], p["ff"]

    m_he = (np.arange(HS)[:, None] // SEQ ==
            np.arange(EMB)[None, :] // HEAD_DIM).astype(np.float32)
    bsum = (np.arange(HS)[:, None] // SEQ ==
            np.arange(HS)[None, :] // SEQ).astype(np.float32)

    mats = {
        "w_qkv1": jnp.concatenate(
            [m1["q_w"].T * inv_scale, m1["k_w"].T, m1["v_w"].T], axis=1),
        "wp1": m1["p_w"].T,
        "w1n": gs["w1_w"].T,
        "w2n": gs["w2_w"].T,
        "w3n": gs["w3_w"].T,
        "w_qv2": jnp.concatenate([m2["q_w"].T * inv_scale, m2["v_w"].T], axis=1),
        "wk2": m2["k_w"].T,
        "wp2": m2["p_w"].T,
        "w1f": ff["w1_w"].T,
        "w2f": ff["w2_w"].T,
        "m_he": jnp.asarray(m_he),
        "bsum": jnp.asarray(bsum),
    }
    w_pack = jnp.zeros((W_ROWS, PACK_COLS), jnp.float32)
    for name, (r0, rr, cc) in _W_OFF.items():
        w_pack = w_pack.at[r0:r0 + rr, 0:cc].set(mats[name].astype(jnp.float32))

    vecs = {
        "ln1_g": p["ln1_g"], "ln1_b": p["ln1_b"],
        "b_qkv1": jnp.concatenate([m1["q_b"] * inv_scale, m1["k_b"], m1["v_b"]]),
        "bp1": m1["p_b"],
        "ln2_g": p["ln2_g"], "ln2_b": p["ln2_b"],
        "b1n": gs["w1_b"], "b2n": gs["w2_b"], "b3n": gs["w3_b"],
        "b_qv2": jnp.concatenate([m2["q_b"] * inv_scale, m2["v_b"]]),
        "bk2": m2["k_b"], "bp2": m2["p_b"],
        "ln3_g": p["ln3_g"], "ln3_b": p["ln3_b"],
        "b1f": ff["w1_b"], "b2f": ff["w2_b"],
    }
    v_pack = jnp.zeros((V_ROWS, PACK_COLS), jnp.float32)
    for name, (i, cc) in _V_OFF.items():
        v_pack = v_pack.at[i, 0:cc].set(vecs[name].astype(jnp.float32))
    return w_pack, v_pack


def transformer_decoder_block(x_graph, x_neigh, ent, params):
    """x_graph: (1, SEQ, EMB), x_neigh: (1, NEIGH, EMB), ent: (1, EMB)."""
    assert x_graph.shape == (1, SEQ, EMB)
    assert x_neigh.shape == (1, NEIGH, EMB)
    assert ent.shape == (1, EMB)

    data = jnp.concatenate(
        [x_graph.reshape(SEQ, EMB),
         x_neigh.reshape(NEIGH, EMB),
         ent.reshape(1, EMB)], axis=0).astype(jnp.float32)      # (DATA_ROWS, E)
    w_pack, v_pack = _pack_weights(params)

    out = pl.pallas_call(
        decoder_block_kernel,
        out_shape=jax.ShapeDtypeStruct((SEQ, EMB), jnp.float32),
        grid=(1,),
        in_specs=[
            pl.BlockSpec((DATA_ROWS, EMB), lambda i: (0, 0)),
            pl.BlockSpec((W_ROWS, PACK_COLS), lambda i: (0, 0)),
            pl.BlockSpec((V_ROWS, PACK_COLS), lambda i: (0, 0)),
        ],
        out_specs=pl.BlockSpec((SEQ, EMB), lambda i: (0, 0)),
        compiler_params=pltpu.CompilerParams(dimension_semantics=("arbitrary",)),
    )(data, w_pack, v_pack)
    return out.reshape(1, SEQ, EMB)


# ---------------------------- pure-JAX reference -------------------------------
def reference(x_graph, x_neigh, ent, p):
    S, E, H, Dh = SEQ, EMB, HEADS, HEAD_DIM
    xg = x_graph.reshape(S, E)
    xn = x_neigh.reshape(NEIGH, E)
    ent2 = ent.reshape(1, E)

    def ln(v, g, b):
        mu = v.mean(-1, keepdims=True)
        var = ((v - mu) ** 2).mean(-1, keepdims=True)
        return (v - mu) / jnp.sqrt(var + EPS) * g + b

    def linear(v, w, b):
        return v @ w.T + b

    def mha(q_in, k_in, v_in, m):
        Q = linear(q_in, m["q_w"], m["q_b"])
        K = linear(k_in, m["k_w"], m["k_b"])
        Vv = linear(v_in, m["v_w"], m["v_b"])
        split = lambda t: t.reshape(-1, H, Dh).transpose(1, 0, 2)   # (H, S, Dh)
        q, k, v = split(Q), split(K), split(Vv)
        energy = jnp.einsum("hqd,hkd->hqk", q, k) / SCALE
        att = jax.nn.softmax(energy, axis=-1)
        out = jnp.einsum("hqk,hkd->hqd", att, v)
        out = out.transpose(1, 0, 2).reshape(-1, E)
        return linear(out, m["p_w"], m["p_b"])

    x1 = ln(xg, p["ln1_g"], p["ln1_b"])
    x_res1 = mha(x1, x1, x1, p["mha1"]) + xg
    x2 = ln(x_res1, p["ln2_g"], p["ln2_b"])

    gs = p["gs"]
    wneigh = linear(xn, gs["w1_w"], gs["w1_b"])
    agg = wneigh.mean(0, keepdims=True)
    cat = jnp.concatenate([agg, ent2], axis=-1)
    c = jax.nn.softmax(linear(cat, gs["w2_w"], gs["w2_b"]), axis=-1)
    rep = jnp.broadcast_to(c, (S, 2 * E))
    neigh_att = jax.nn.softmax(linear(rep, gs["w3_w"], gs["w3_b"]), axis=-1)

    x_res2 = mha(x2, neigh_att, x2, p["mha2"]) + x_res1
    x3 = ln(x_res2, p["ln3_g"], p["ln3_b"])
    f = p["ff"]
    h = linear(x3, f["w1_w"], f["w1_b"])
    h = 0.5 * h * (1.0 + lax.erf(h / math.sqrt(2.0)))
    out = linear(h, f["w2_w"], f["w2_b"]) + x_res2
    return out.reshape(1, S, E)


# --------------------------------- params --------------------------------------
def make_params(key):
    keys = iter(jax.random.split(key, 64))
    s = 0.05

    def vec(shape, scale=s):
        return (scale * jax.random.normal(next(keys), shape)).astype(jnp.float32)

    def lin(out_dim, in_dim):
        return vec((out_dim, in_dim)), vec((out_dim,))

    def mha_params():
        qw, qb = lin(EMB, EMB)
        kw, kb = lin(EMB, EMB)
        vw, vb = lin(EMB, EMB)
        pw, pb = lin(EMB, EMB)
        return {"q_w": qw, "q_b": qb, "k_w": kw, "k_b": kb,
                "v_w": vw, "v_b": vb, "p_w": pw, "p_b": pb}

    gw1, gb1 = lin(EMB, EMB)
    gw2, gb2 = lin(2 * EMB, 2 * EMB)
    gw3, gb3 = lin(EMB, 2 * EMB)
    fw1, fb1 = lin(HIDDEN, EMB)
    fw2, fb2 = lin(EMB, HIDDEN)

    return {
        "ln1_g": 1.0 + vec((EMB,)), "ln1_b": vec((EMB,)),
        "mha1": mha_params(),
        "ln2_g": 1.0 + vec((EMB,)), "ln2_b": vec((EMB,)),
        "gs": {"w1_w": gw1, "w1_b": gb1, "w2_w": gw2, "w2_b": gb2,
               "w3_w": gw3, "w3_b": gb3},
        "mha2": mha_params(),
        "ln3_g": 1.0 + vec((EMB,)), "ln3_b": vec((EMB,)),
        "ff": {"w1_w": fw1, "w1_b": fb1, "w2_w": fw2, "w2_b": fb2},
    }


# ---------------------------------- main ----------------------------------------
if __name__ == "__main__":
    key = jax.random.PRNGKey(0)
    kx, kn, ke, kp = jax.random.split(key, 4)
    x_graph = jax.random.normal(kx, (1, SEQ, EMB), dtype=jnp.float32)
    x_neigh = jax.random.normal(kn, (1, NEIGH, EMB), dtype=jnp.float32)
    ent = jax.random.normal(ke, (1, EMB), dtype=jnp.float32)
    params = make_params(kp)

    out = transformer_decoder_block(x_graph, x_neigh, ent, params)
    out = jax.block_until_ready(out)

    ref = reference(x_graph, x_neigh, ent, params)
    np.testing.assert_allclose(np.asarray(out), np.asarray(ref), atol=2e-3, rtol=2e-3)

    print("KERNEL_OK")
</pallas_src>

<mosaic_0001>
module attributes {stable_mosaic.version = 11 : i64} {
  func.func @decoder_block_kernel(%arg0: i32, %arg1: memref<17x32xf32, #tpu.memory_space<vmem>>, %arg2: memref<544x128xf32, #tpu.memory_space<vmem>>, %arg3: memref<16x128xf32, #tpu.memory_space<vmem>>, %arg4: memref<8x32xf32, #tpu.memory_space<vmem>>) attributes {dimension_semantics = [#tpu.dimension_semantics<arbitrary>], iteration_bounds = array<i64: 1>, scalar_prefetch = 0 : i64, scratch_operands = 0 : i64, tpu.core_type = #tpu.core_type<tc>, window_params = [{pipeline_mode = #tpu.pipeline_mode<synchronous>, transform_indices = @transform_0, window_bounds = array<i64: 17, 32>}, {pipeline_mode = #tpu.pipeline_mode<synchronous>, transform_indices = @transform_1, window_bounds = array<i64: 544, 128>}, {pipeline_mode = #tpu.pipeline_mode<synchronous>, transform_indices = @transform_2, window_bounds = array<i64: 16, 128>}, {pipeline_mode = #tpu.pipeline_mode<synchronous>, transform_indices = @transform_3, window_bounds = array<i64: 8, 32>}]} {
    %c0 = arith.constant 0 : index
    %c0_0 = arith.constant 0 : index
    %0 = vector.load %arg1[%c0, %c0_0] : memref<17x32xf32, #tpu.memory_space<vmem>>, vector<8x32xf32>
    %c8 = arith.constant 8 : index
    %c0_1 = arith.constant 0 : index
    %1 = vector.load %arg1[%c8, %c0_1] : memref<17x32xf32, #tpu.memory_space<vmem>>, vector<8x32xf32>
    %c16 = arith.constant 16 : index
    %c0_2 = arith.constant 0 : index
    %2 = vector.load %arg1[%c16, %c0_2] : memref<17x32xf32, #tpu.memory_space<vmem>>, vector<1x32xf32>
    %c480 = arith.constant 480 : index
    %c0_3 = arith.constant 0 : index
    %3 = vector.load %arg2[%c480, %c0_3] : memref<544x128xf32, #tpu.memory_space<vmem>>, vector<32x32xf32>
    %c512 = arith.constant 512 : index
    %c0_4 = arith.constant 0 : index
    %4 = vector.load %arg2[%c512, %c0_4] : memref<544x128xf32, #tpu.memory_space<vmem>>, vector<32x32xf32>
    %c0_5 = arith.constant 0 : index
    %c0_6 = arith.constant 0 : index
    %5 = vector.load %arg3[%c0_5, %c0_6] : memref<16x128xf32, #tpu.memory_space<vmem>>, vector<1x32xf32>
    %c1 = arith.constant 1 : index
    %c0_7 = arith.constant 0 : index
    %6 = vector.load %arg3[%c1, %c0_7] : memref<16x128xf32, #tpu.memory_space<vmem>>, vector<1x32xf32>
    %cst = arith.constant dense<0.000000e+00> : vector<8xf32>
    %7 = vector.multi_reduction <add>, %0, %cst [1] : vector<8x32xf32> to vector<8xf32>
    %8 = vector.shape_cast %7 : vector<8xf32> to vector<8x1xf32>
    %cst_8 = arith.constant 3.200000e+01 : f32
    %9 = vector.broadcast %cst_8 : f32 to vector<8x1xf32>
    %10 = arith.divf %8, %9 : vector<8x1xf32>
    %11 = vector.broadcast %10 : vector<8x1xf32> to vector<8x32xf32>
    %12 = arith.subf %0, %11 : vector<8x32xf32>
    %13 = vector.broadcast %10 : vector<8x1xf32> to vector<8x32xf32>
    %14 = arith.subf %0, %13 : vector<8x32xf32>
    %15 = arith.mulf %12, %14 : vector<8x32xf32>
    %cst_9 = arith.constant dense<0.000000e+00> : vector<8xf32>
    %16 = vector.multi_reduction <add>, %15, %cst_9 [1] : vector<8x32xf32> to vector<8xf32>
    %17 = vector.shape_cast %16 : vector<8xf32> to vector<8x1xf32>
    %cst_10 = arith.constant 3.200000e+01 : f32
    %18 = vector.broadcast %cst_10 : f32 to vector<8x1xf32>
    %19 = arith.divf %17, %18 : vector<8x1xf32>
    %20 = vector.broadcast %10 : vector<8x1xf32> to vector<8x32xf32>
    %21 = arith.subf %0, %20 : vector<8x32xf32>
    %cst_11 = arith.constant 9.99999974E-6 : f32
    %22 = vector.broadcast %cst_11 : f32 to vector<8x1xf32>
    %23 = arith.addf %19, %22 : vector<8x1xf32>
    %24 = math.rsqrt %23 : vector<8x1xf32>
    %25 = vector.broadcast %24 : vector<8x1xf32> to vector<8x32xf32>
    %26 = arith.mulf %21, %25 : vector<8x32xf32>
    %27 = vector.broadcast %5 : vector<1x32xf32> to vector<8x32xf32>
    %28 = arith.mulf %26, %27 : vector<8x32xf32>
    %29 = vector.broadcast %6 : vector<1x32xf32> to vector<8x32xf32>
    %30 = arith.addf %28, %29 : vector<8x32xf32>
    %c0_12 = arith.constant 0 : index
    %c0_13 = arith.constant 0 : index
    %31 = vector.load %arg2[%c0_12, %c0_13] : memref<544x128xf32, #tpu.memory_space<vmem>>, vector<32x96xf32>
    %cst_14 = arith.constant dense<0.000000e+00> : vector<8x96xf32>
    %32 = tpu.matmul %30, %31, %cst_14 {dimension_numbers = #tpu.dot_dimension_numbers<[1], [0], [0], [1], [0, 0, 1, 1], [], []>} : vector<8x32xf32>, vector<32x96xf32>, vector<8x96xf32> -> vector<8x96xf32>
    %c2 = arith.constant 2 : index
    %c0_15 = arith.constant 0 : index
    %33 = vector.load %arg3[%c2, %c0_15] : memref<16x128xf32, #tpu.memory_space<vmem>>, vector<1x96xf32>
    %34 = vector.broadcast %33 : vector<1x96xf32> to vector<8x96xf32>
    %35 = arith.addf %32, %34 : vector<8x96xf32>
    %36 = vector.extract_strided_slice %35 {offsets = [0, 0], sizes = [8, 32], strides = [1, 1]} : vector<8x96xf32> to vector<8x32xf32>
    %37 = vector.extract_strided_slice %35 {offsets = [0, 32], sizes = [8, 32], strides = [1, 1]} : vector<8x96xf32> to vector<8x32xf32>
    %38 = vector.extract_strided_slice %35 {offsets = [0, 64], sizes = [8, 32], strides = [1, 1]} : vector<8x96xf32> to vector<8x32xf32>
    %c32 = arith.constant 32 : index
    %c0_16 = arith.constant 0 : index
    %39 = vector.load %arg2[%c32, %c0_16] : memref<544x128xf32, #tpu.memory_space<vmem>>, vector<32x32xf32>
    %c3 = arith.constant 3 : index
    %c0_17 = arith.constant 0 : index
    %40 = vector.load %arg3[%c3, %c0_17] : memref<16x128xf32, #tpu.memory_space<vmem>>, vector<1x32xf32>
    %41 = tpu.concatenate %37, %37, %37, %37 in 0 : vector<8x32xf32>, vector<8x32xf32>, vector<8x32xf32>, vector<8x32xf32> -> vector<32x32xf32>
    %42 = arith.mulf %41, %3 : vector<32x32xf32>
    %43 = tpu.concatenate %38, %38, %38, %38 in 0 : vector<8x32xf32>, vector<8x32xf32>, vector<8x32xf32>, vector<8x32xf32> -> vector<32x32xf32>
    %44 = arith.mulf %43, %3 : vector<32x32xf32>
    %cst_18 = arith.constant dense<0.000000e+00> : vector<8x32xf32>
    %45 = tpu.matmul %36, %42, %cst_18 {dimension_numbers = #tpu.dot_dimension_numbers<[1], [1], [0], [0], [0, 0, 1, 0], [], []>} : vector<8x32xf32>, vector<32x32xf32>, vector<8x32xf32> -> vector<8x32xf32>
    %cst_19 = arith.constant dense<0xFF800000> : vector<8xf32>
    %46 = vector.multi_reduction <maximumf>, %45, %cst_19 [1] : vector<8x32xf32> to vector<8xf32>
    %47 = vector.shape_cast %46 : vector<8xf32> to vector<8x1xf32>
    %48 = vector.broadcast %47 : vector<8x1xf32> to vector<8x32xf32>
    %49 = arith.subf %45, %48 : vector<8x32xf32>
    %50 = math.exp %49 : vector<8x32xf32>
    %cst_20 = arith.constant dense<0.000000e+00> : vector<8x32xf32>
    %51 = tpu.matmul %50, %4, %cst_20 {dimension_numbers = #tpu.dot_dimension_numbers<[1], [0], [0], [1], [0, 0, 1, 1], [], []>} : vector<8x32xf32>, vector<32x32xf32>, vector<8x32xf32> -> vector<8x32xf32>
    %52 = tpu.reciprocal %51 {approx = true} : vector<8x32xf32> -> vector<8x32xf32>
    %53 = arith.mulf %50, %52 : vector<8x32xf32>
    %cst_21 = arith.constant dense<0.000000e+00> : vector<8x32xf32>
    %54 = tpu.matmul %53, %44, %cst_21 {dimension_numbers = #tpu.dot_dimension_numbers<[1], [0], [0], [1], [0, 0, 1, 1], [], []>} : vector<8x32xf32>, vector<32x32xf32>, vector<8x32xf32> -> vector<8x32xf32>
    %cst_22 = arith.constant dense<0.000000e+00> : vector<8x32xf32>
    %55 = tpu.matmul %54, %39, %cst_22 {dimension_numbers = #tpu.dot_dimension_numbers<[1], [0], [0], [1], [0, 0, 1, 1], [], []>} : vector<8x32xf32>, vector<32x32xf32>, vector<8x32xf32> -> vector<8x32xf32>
    %56 = vector.broadcast %40 : vector<1x32xf32> to vector<8x32xf32>
    %57 = arith.addf %55, %56 : vector<8x32xf32>
    %58 = arith.addf %57, %0 : vector<8x32xf32>
    %c4 = arith.constant 4 : index
    %c0_23 = arith.constant 0 : index
    %59 = vector.load %arg3[%c4, %c0_23] : memref<16x128xf32, #tpu.memory_space<vmem>>, vector<1x32xf32>
    %c5 = arith.constant 5 : index
    %c0_24 = arith.constant 0 : index
    %60 = vector.load %arg3[%c5, %c0_24] : memref<16x128xf32, #tpu.memory_space<vmem>>, vector<1x32xf32>
    %cst_25 = arith.constant dense<0.000000e+00> : vector<8xf32>
    %61 = vector.multi_reduction <add>, %58, %cst_25 [1] : vector<8x32xf32> to vector<8xf32>
    %62 = vector.shape_cast %61 : vector<8xf32> to vector<8x1xf32>
    %cst_26 = arith.constant 3.200000e+01 : f32
    %63 = vector.broadcast %cst_26 : f32 to vector<8x1xf32>
    %64 = arith.divf %62, %63 : vector<8x1xf32>
    %65 = vector.broadcast %64 : vector<8x1xf32> to vector<8x32xf32>
    %66 = arith.subf %58, %65 : vector<8x32xf32>
    %67 = vector.broadcast %64 : vector<8x1xf32> to vector<8x32xf32>
    %68 = arith.subf %58, %67 : vector<8x32xf32>
    %69 = arith.mulf %66, %68 : vector<8x32xf32>
    %cst_27 = arith.constant dense<0.000000e+00> : vector<8xf32>
    %70 = vector.multi_reduction <add>, %69, %cst_27 [1] : vector<8x32xf32> to vector<8xf32>
    %71 = vector.shape_cast %70 : vector<8xf32> to vector<8x1xf32>
    %cst_28 = arith.constant 3.200000e+01 : f32
    %72 = vector.broadcast %cst_28 : f32 to vector<8x1xf32>
    %73 = arith.divf %71, %72 : vector<8x1xf32>
    %74 = vector.broadcast %64 : vector<8x1xf32> to vector<8x32xf32>
    %75 = arith.subf %58, %74 : vector<8x32xf32>
    %cst_29 = arith.constant 9.99999974E-6 : f32
    %76 = vector.broadcast %cst_29 : f32 to vector<8x1xf32>
    %77 = arith.addf %73, %76 : vector<8x1xf32>
    %78 = math.rsqrt %77 : vector<8x1xf32>
    %79 = vector.broadcast %78 : vector<8x1xf32> to vector<8x32xf32>
    %80 = arith.mulf %75, %79 : vector<8x32xf32>
    %81 = vector.broadcast %59 : vector<1x32xf32> to vector<8x32xf32>
    %82 = arith.mulf %80, %81 : vector<8x32xf32>
    %83 = vector.broadcast %60 : vector<1x32xf32> to vector<8x32xf32>
    %84 = arith.addf %82, %83 : vector<8x32xf32>
    %c64 = arith.constant 64 : index
    %c0_30 = arith.constant 0 : index
    %85 = vector.load %arg2[%c64, %c0_30] : memref<544x128xf32, #tpu.memory_space<vmem>>, vector<32x32xf32>
    %cst_31 = arith.constant dense<0.000000e+00> : vector<8x32xf32>
    %86 = tpu.matmul %1, %85, %cst_31 {dimension_numbers = #tpu.dot_dimension_numbers<[1], [0], [0], [1], [0, 0, 1, 1], [], []>} : vector<8x32xf32>, vector<32x32xf32>, vector<8x32xf32> -> vector<8x32xf32>
    %c6 = arith.constant 6 : index
    %c0_32 = arith.constant 0 : index
    %87 = vector.load %arg3[%c6, %c0_32] : memref<16x128xf32, #tpu.memory_space<vmem>>, vector<1x32xf32>
    %88 = vector.broadcast %87 : vector<1x32xf32> to vector<8x32xf32>
    %89 = arith.addf %86, %88 : vector<8x32xf32>
    %cst_33 = arith.constant 1.250000e-01 : f32
    %90 = vector.broadcast %cst_33 : f32 to vector<1x8xf32>
    %cst_34 = arith.constant dense<0.000000e+00> : vector<1x32xf32>
    %91 = tpu.matmul %90, %89, %cst_34 {dimension_numbers = #tpu.dot_dimension_numbers<[1], [0], [0], [1], [0, 0, 1, 1], [], []>} : vector<1x8xf32>, vector<8x32xf32>, vector<1x32xf32> -> vector<1x32xf32>
    %c96 = arith.constant 96 : index
    %c0_35 = arith.constant 0 : index
    %92 = vector.load %arg2[%c96, %c0_35] : memref<544x128xf32, #tpu.memory_space<vmem>>, vector<64x64xf32>
    %93 = vector.extract_strided_slice %92 {offsets = [0, 0], sizes = [32, 64], strides = [1, 1]} : vector<64x64xf32> to vector<32x64xf32>
    %cst_36 = arith.constant dense<0.000000e+00> : vector<1x64xf32>
    %94 = tpu.matmul %91, %93, %cst_36 {dimension_numbers = #tpu.dot_dimension_numbers<[1], [0], [0], [1], [0, 0, 1, 1], [], []>} : vector<1x32xf32>, vector<32x64xf32>, vector<1x64xf32> -> vector<1x64xf32>
    %95 = vector.extract_strided_slice %92 {offsets = [32, 0], sizes = [32, 64], strides = [1, 1]} : vector<64x64xf32> to vector<32x64xf32>
    %cst_37 = arith.constant dense<0.000000e+00> : vector<1x64xf32>
    %96 = tpu.matmul %2, %95, %cst_37 {dimension_numbers = #tpu.dot_dimension_numbers<[1], [0], [0], [1], [0, 0, 1, 1], [], []>} : vector<1x32xf32>, vector<32x64xf32>, vector<1x64xf32> -> vector<1x64xf32>
    %97 = arith.addf %94, %96 : vector<1x64xf32>
    %c7 = arith.constant 7 : index
    %c0_38 = arith.constant 0 : index
    %98 = vector.load %arg3[%c7, %c0_38] : memref<16x128xf32, #tpu.memory_space<vmem>>, vector<1x64xf32>
    %99 = arith.addf %97, %98 : vector<1x64xf32>
    %cst_39 = arith.constant dense<0xFF800000> : vector<1xf32>
    %100 = vector.multi_reduction <maximumf>, %99, %cst_39 [1] : vector<1x64xf32> to vector<1xf32>
    %101 = vector.shape_cast %100 : vector<1xf32> to vector<1x1xf32>
    %102 = vector.broadcast %101 : vector<1x1xf32> to vector<1x64xf32>
    %103 = arith.subf %99, %102 : vector<1x64xf32>
    %104 = math.exp %103 : vector<1x64xf32>
    %cst_40 = arith.constant dense<0.000000e+00> : vector<1xf32>
    %105 = vector.multi_reduction <add>, %104, %cst_40 [1] : vector<1x64xf32> to vector<1xf32>
    %106 = vector.shape_cast %105 : vector<1xf32> to vector<1x1xf32>
    %107 = tpu.reciprocal %106 {approx = true} : vector<1x1xf32> -> vector<1x1xf32>
    %108 = vector.broadcast %107 : vector<1x1xf32> to vector<1x64xf32>
    %109 = arith.mulf %104, %108 : vector<1x64xf32>
    %110 = vector.shape_cast %109 : vector<1x64xf32> to vector<1x64xf32>
    %111 = vector.broadcast %110 : vector<1x64xf32> to vector<8x64xf32>
    %c160 = arith.constant 160 : index
    %c0_41 = arith.constant 0 : index
    %112 = vector.load %arg2[%c160, %c0_41] : memref<544x128xf32, #tpu.memory_space<vmem>>, vector<64x32xf32>
    %cst_42 = arith.constant dense<0.000000e+00> : vector<8x32xf32>
    %113 = tpu.matmul %111, %112, %cst_42 {dimension_numbers = #tpu.dot_dimension_numbers<[1], [0], [0], [1], [0, 0, 1, 1], [], []>} : vector<8x64xf32>, vector<64x32xf32>, vector<8x32xf32> -> vector<8x32xf32>
    %c8_43 = arith.constant 8 : index
    %c0_44 = arith.constant 0 : index
    %114 = vector.load %arg3[%c8_43, %c0_44] : memref<16x128xf32, #tpu.memory_space<vmem>>, vector<1x32xf32>
    %115 = vector.broadcast %114 : vector<1x32xf32> to vector<8x32xf32>
    %116 = arith.addf %113, %115 : vector<8x32xf32>
    %cst_45 = arith.constant dense<0xFF800000> : vector<8xf32>
    %117 = vector.multi_reduction <maximumf>, %116, %cst_45 [1] : vector<8x32xf32> to vector<8xf32>
    %118 = vector.shape_cast %117 : vector<8xf32> to vector<8x1xf32>
    %119 = vector.broadcast %118 : vector<8x1xf32> to vector<8x32xf32>
    %120 = arith.subf %116, %119 : vector<8x32xf32>
    %121 = math.exp %120 : vector<8x32xf32>
    %cst_46 = arith.constant dense<0.000000e+00> : vector<8xf32>
    %122 = vector.multi_reduction <add>, %121, %cst_46 [1] : vector<8x32xf32> to vector<8xf32>
    %123 = vector.shape_cast %122 : vector<8xf32> to vector<8x1xf32>
    %124 = tpu.reciprocal %123 {approx = true} : vector<8x1xf32> -> vector<8x1xf32>
    %125 = vector.broadcast %124 : vector<8x1xf32> to vector<8x32xf32>
    %126 = arith.mulf %121, %125 : vector<8x32xf32>
    %c224 = arith.constant 224 : index
    %c0_47 = arith.constant 0 : index
    %127 = vector.load %arg2[%c224, %c0_47] : memref<544x128xf32, #tpu.memory_space<vmem>>, vector<32x64xf32>
    %cst_48 = arith.constant dense<0.000000e+00> : vector<8x64xf32>
    %128 = tpu.matmul %84, %127, %cst_48 {dimension_numbers = #tpu.dot_dimension_numbers<[1], [0], [0], [1], [0, 0, 1, 1], [], []>} : vector<8x32xf32>, vector<32x64xf32>, vector<8x64xf32> -> vector<8x64xf32>
    %c9 = arith.constant 9 : index
    %c0_49 = arith.constant 0 : index
    %129 = vector.load %arg3[%c9, %c0_49] : memref<16x128xf32, #tpu.memory_space<vmem>>, vector<1x64xf32>
    %130 = vector.broadcast %129 : vector<1x64xf32> to vector<8x64xf32>
    %131 = arith.addf %128, %130 : vector<8x64xf32>
    %c256 = arith.constant 256 : index
    %c0_50 = arith.constant 0 : index
    %132 = vector.load %arg2[%c256, %c0_50] : memref<544x128xf32, #tpu.memory_space<vmem>>, vector<32x32xf32>
    %cst_51 = arith.constant dense<0.000000e+00> : vector<8x32xf32>
    %133 = tpu.matmul %126, %132, %cst_51 {dimension_numbers = #tpu.dot_dimension_numbers<[1], [0], [0], [1], [0, 0, 1, 1], [], []>} : vector<8x32xf32>, vector<32x32xf32>, vector<8x32xf32> -> vector<8x32xf32>
    %c10 = arith.constant 10 : index
    %c0_52 = arith.constant 0 : index
    %134 = vector.load %arg3[%c10, %c0_52] : memref<16x128xf32, #tpu.memory_space<vmem>>, vector<1x32xf32>
    %135 = vector.broadcast %134 : vector<1x32xf32> to vector<8x32xf32>
    %136 = arith.addf %133, %135 : vector<8x32xf32>
    %137 = vector.extract_strided_slice %131 {offsets = [0, 0], sizes = [8, 32], strides = [1, 1]} : vector<8x64xf32> to vector<8x32xf32>
    %138 = vector.extract_strided_slice %131 {offsets = [0, 32], sizes = [8, 32], strides = [1, 1]} : vector<8x64xf32> to vector<8x32xf32>
    %c288 = arith.constant 288 : index
    %c0_53 = arith.constant 0 : index
    %139 = vector.load %arg2[%c288, %c0_53] : memref<544x128xf32, #tpu.memory_space<vmem>>, vector<32x32xf32>
    %c11 = arith.constant 11 : index
    %c0_54 = arith.constant 0 : index
    %140 = vector.load %arg3[%c11, %c0_54] : memref<16x128xf32, #tpu.memory_space<vmem>>, vector<1x32xf32>
    %141 = tpu.concatenate %136, %136, %136, %136 in 0 : vector<8x32xf32>, vector<8x32xf32>, vector<8x32xf32>, vector<8x32xf32> -> vector<32x32xf32>
    %142 = arith.mulf %141, %3 : vector<32x32xf32>
    %143 = tpu.concatenate %138, %138, %138, %138 in 0 : vector<8x32xf32>, vector<8x32xf32>, vector<8x32xf32>, vector<8x32xf32> -> vector<32x32xf32>
    %144 = arith.mulf %143, %3 : vector<32x32xf32>
    %cst_55 = arith.constant dense<0.000000e+00> : vector<8x32xf32>
    %145 = tpu.matmul %137, %142, %cst_55 {dimension_numbers = #tpu.dot_dimension_numbers<[1], [1], [0], [0], [0, 0, 1, 0], [], []>} : vector<8x32xf32>, vector<32x32xf32>, vector<8x32xf32> -> vector<8x32xf32>
    %cst_56 = arith.constant dense<0xFF800000> : vector<8xf32>
    %146 = vector.multi_reduction <maximumf>, %145, %cst_56 [1] : vector<8x32xf32> to vector<8xf32>
    %147 = vector.shape_cast %146 : vector<8xf32> to vector<8x1xf32>
    %148 = vector.broadcast %147 : vector<8x1xf32> to vector<8x32xf32>
    %149 = arith.subf %145, %148 : vector<8x32xf32>
    %150 = math.exp %149 : vector<8x32xf32>
    %cst_57 = arith.constant dense<0.000000e+00> : vector<8x32xf32>
    %151 = tpu.matmul %150, %4, %cst_57 {dimension_numbers = #tpu.dot_dimension_numbers<[1], [0], [0], [1], [0, 0, 1, 1], [], []>} : vector<8x32xf32>, vector<32x32xf32>, vector<8x32xf32> -> vector<8x32xf32>
    %152 = tpu.reciprocal %151 {approx = true} : vector<8x32xf32> -> vector<8x32xf32>
    %153 = arith.mulf %150, %152 : vector<8x32xf32>
    %cst_58 = arith.constant dense<0.000000e+00> : vector<8x32xf32>
    %154 = tpu.matmul %153, %144, %cst_58 {dimension_numbers = #tpu.dot_dimension_numbers<[1], [0], [0], [1], [0, 0, 1, 1], [], []>} : vector<8x32xf32>, vector<32x32xf32>, vector<8x32xf32> -> vector<8x32xf32>
    %cst_59 = arith.constant dense<0.000000e+00> : vector<8x32xf32>
    %155 = tpu.matmul %154, %139, %cst_59 {dimension_numbers = #tpu.dot_dimension_numbers<[1], [0], [0], [1], [0, 0, 1, 1], [], []>} : vector<8x32xf32>, vector<32x32xf32>, vector<8x32xf32> -> vector<8x32xf32>
    %156 = vector.broadcast %140 : vector<1x32xf32> to vector<8x32xf32>
    %157 = arith.addf %155, %156 : vector<8x32xf32>
    %158 = arith.addf %157, %58 : vector<8x32xf32>
    %c12 = arith.constant 12 : index
    %c0_60 = arith.constant 0 : index
    %159 = vector.load %arg3[%c12, %c0_60] : memref<16x128xf32, #tpu.memory_space<vmem>>, vector<1x32xf32>
    %c13 = arith.constant 13 : index
    %c0_61 = arith.constant 0 : index
    %160 = vector.load %arg3[%c13, %c0_61] : memref<16x128xf32, #tpu.memory_space<vmem>>, vector<1x32xf32>
    %cst_62 = arith.constant dense<0.000000e+00> : vector<8xf32>
    %161 = vector.multi_reduction <add>, %158, %cst_62 [1] : vector<8x32xf32> to vector<8xf32>
    %162 = vector.shape_cast %161 : vector<8xf32> to vector<8x1xf32>
    %cst_63 = arith.constant 3.200000e+01 : f32
    %163 = vector.broadcast %cst_63 : f32 to vector<8x1xf32>
    %164 = arith.divf %162, %163 : vector<8x1xf32>
    %165 = vector.broadcast %164 : vector<8x1xf32> to vector<8x32xf32>
    %166 = arith.subf %158, %165 : vector<8x32xf32>
    %167 = vector.broadcast %164 : vector<8x1xf32> to vector<8x32xf32>
    %168 = arith.subf %158, %167 : vector<8x32xf32>
    %169 = arith.mulf %166, %168 : vector<8x32xf32>
    %cst_64 = arith.constant dense<0.000000e+00> : vector<8xf32>
    %170 = vector.multi_reduction <add>, %169, %cst_64 [1] : vector<8x32xf32> to vector<8xf32>
    %171 = vector.shape_cast %170 : vector<8xf32> to vector<8x1xf32>
    %cst_65 = arith.constant 3.200000e+01 : f32
    %172 = vector.broadcast %cst_65 : f32 to vector<8x1xf32>
    %173 = arith.divf %171, %172 : vector<8x1xf32>
    %174 = vector.broadcast %164 : vector<8x1xf32> to vector<8x32xf32>
    %175 = arith.subf %158, %174 : vector<8x32xf32>
    %cst_66 = arith.constant 9.99999974E-6 : f32
    %176 = vector.broadcast %cst_66 : f32 to vector<8x1xf32>
    %177 = arith.addf %173, %176 : vector<8x1xf32>
    %178 = math.rsqrt %177 : vector<8x1xf32>
    %179 = vector.broadcast %178 : vector<8x1xf32> to vector<8x32xf32>
    %180 = arith.mulf %175, %179 : vector<8x32xf32>
    %181 = vector.broadcast %159 : vector<1x32xf32> to vector<8x32xf32>
    %182 = arith.mulf %180, %181 : vector<8x32xf32>
    %183 = vector.broadcast %160 : vector<1x32xf32> to vector<8x32xf32>
    %184 = arith.addf %182, %183 : vector<8x32xf32>
    %c320 = arith.constant 320 : index
    %c0_67 = arith.constant 0 : index
    %185 = vector.load %arg2[%c320, %c0_67] : memref<544x128xf32, #tpu.memory_space<vmem>>, vector<32x128xf32>
    %cst_68 = arith.constant dense<0.000000e+00> : vector<8x128xf32>
    %186 = tpu.matmul %184, %185, %cst_68 {dimension_numbers = #tpu.dot_dimension_numbers<[1], [0], [0], [1], [0, 0, 1, 1], [], []>} : vector<8x32xf32>, vector<32x128xf32>, vector<8x128xf32> -> vector<8x128xf32>
    %c14 = arith.constant 14 : index
    %c0_69 = arith.constant 0 : index
    %187 = vector.load %arg3[%c14, %c0_69] : memref<16x128xf32, #tpu.memory_space<vmem>>, vector<1x128xf32>
    %188 = vector.broadcast %187 : vector<1x128xf32> to vector<8x128xf32>
    %189 = arith.addf %186, %188 : vector<8x128xf32>
    %cst_70 = arith.constant 5.000000e-01 : f32
    %190 = vector.broadcast %cst_70 : f32 to vector<8x128xf32>
    %191 = arith.mulf %190, %189 : vector<8x128xf32>
    %cst_71 = arith.constant 0.707106769 : f32
    %192 = vector.broadcast %cst_71 : f32 to vector<8x128xf32>
    %193 = arith.mulf %189, %192 : vector<8x128xf32>
    %194 = math.erf %193 : vector<8x128xf32>
    %cst_72 = arith.constant 1.000000e+00 : f32
    %195 = vector.broadcast %cst_72 : f32 to vector<8x128xf32>
    %196 = arith.addf %195, %194 : vector<8x128xf32>
    %197 = arith.mulf %191, %196 : vector<8x128xf32>
    %c352 = arith.constant 352 : index
    %c0_73 = arith.constant 0 : index
    %198 = vector.load %arg2[%c352, %c0_73] : memref<544x128xf32, #tpu.memory_space<vmem>>, vector<128x32xf32>
    %cst_74 = arith.constant dense<0.000000e+00> : vector<8x32xf32>
    %199 = tpu.matmul %197, %198, %cst_74 {dimension_numbers = #tpu.dot_dimension_numbers<[1], [0], [0], [1], [0, 0, 1, 1], [], []>} : vector<8x128xf32>, vector<128x32xf32>, vector<8x32xf32> -> vector<8x32xf32>
    %c15 = arith.constant 15 : index
    %c0_75 = arith.constant 0 : index
    %200 = vector.load %arg3[%c15, %c0_75] : memref<16x128xf32, #tpu.memory_space<vmem>>, vector<1x32xf32>
    %201 = vector.broadcast %200 : vector<1x32xf32> to vector<8x32xf32>
    %202 = arith.addf %199, %201 : vector<8x32xf32>
    %203 = arith.addf %202, %158 : vector<8x32xf32>
    %c0_76 = arith.constant 0 : index
    %c0_77 = arith.constant 0 : index
    %204 = vector.load %arg4[%c0_76, %c0_77] : memref<8x32xf32, #tpu.memory_space<vmem>>, vector<8x32xf32>
    tpu.vector_store %arg4[%c0_76, %c0_77], %203 {strides = array<i32>} : memref<8x32xf32, #tpu.memory_space<vmem>>, vector<8x32xf32>,
    return
  }
  func.func @transform_0(%arg0: i32) -> (i32, i32) {
    %c0_i32 = arith.constant 0 : i32
    %c0_i32_0 = arith.constant 0 : i32
    %c0_i32_1 = arith.constant 0 : i32
    return %c0_i32, %c0_i32_0 : i32, i32
  }
  func.func @transform_1(%arg0: i32) -> (i32, i32) {
    %c0_i32 = arith.constant 0 : i32
    %c0_i32_0 = arith.constant 0 : i32
    %c0_i32_1 = arith.constant 0 : i32
    return %c0_i32, %c0_i32_0 : i32, i32
  }
  func.func @transform_2(%arg0: i32) -> (i32, i32) {
    %c0_i32 = arith.constant 0 : i32
    %c0_i32_0 = arith.constant 0 : i32
    %c0_i32_1 = arith.constant 0 : i32
    return %c0_i32, %c0_i32_0 : i32, i32
  }
  func.func @transform_3(%arg0: i32) -> (i32, i32) {
    %c0_i32 = arith.constant 0 : i32
    %c0_i32_0 = arith.constant 0 : i32
    %c0_i32_1 = arith.constant 0 : i32
    return %c0_i32, %c0_i32_0 : i32, i32
  }
}

</mosaic_0001>

<bundles_post_ra>
// kernel: tpu_custom_call.1
= control target key start
LH: loop header
LB: loop body
LE: loop exit
PB: predicated region body
PF: predicated region fallthrough
CT: control target
= control target key end

     0   :  { %8 = vsyncpa [#allocation3], 0  ;;  %s2683_s0 = inlined_call_operand.hbm [shape: f32[17,32], index: 0, kind: input, shape index: {}]   ;;  %s2684_s1 = inlined_call_operand.hbm [shape: f32[544,128], index: 1, kind: input, shape index: {}]   ;;  %s2685_s2 = inlined_call_operand.hbm [shape: f32[16,128], index: 2, kind: input, shape index: {}]   ;;  %s2686_s3 = inlined_call_operand.hbm [shape: f32[8,32], index: 3, kind: output, shape index: {}]  }
   0x1   :  { %9 = vsyncpa [#allocation6], 0 }
   0x2   :  { %10 = vsyncpa [#allocation4], 0  ;;  %s2398_s12 = smov [#allocation5]   ;;  %s2399_s14 = smov [#allocation2]  }
   0x3   :  { %s28_s13 = sshll.u32 %s2398_s12, 4  ;;  %s16_s15 = sshll.u32 %s2399_s14, 4  ;;  %s29_s13 = int_to_ptr.vmem [resolvable:$true] %s28_s13  ;;  %s2431_s15 = int_to_ptr.vmem [resolvable:$true] %s16_s15 }
   0x4   :  { %s2304_s18 = scalar_lea.hbm %s2684_s1, 8704 }
   0x5   :  { %p2305_p0 = scmp.ne.s32.totalorder %s2684_s1, %s2304_s18  ;;  %p2308_p1 = scmp.lt.u32.totalorder %s2304_s18, %s2684_s1 }
   0x7   :  { %p2310_p2 = pnand %p2308_p1, %p2305_p0 }
   0x9   :  { %2313 = shalt.err (!%p2310_p2)
}
   0xa   :  { %s2314_s23 = scalar_lea.vmem %s29_s13, 8704  ;;  %p2319_p4 = scmp.lt.s32.totalorder %s29_s13, %s29_s13 }
   0xb   :  { %p2315_p3 = scmp.ne.s32.totalorder %s29_s13, %s2314_s23  ;;  %p2320_p5 = scmp.lt.s32.totalorder %s2314_s23, %s2314_s23 }
   0xd   :  { %p2321_p6 = por %p2320_p5, %p2319_p4 }
   0xf   :  { %p2322_p7 = pnand %p2321_p6, %p2315_p3 }
  0x11   :  { %2325 = shalt.err (!%p2322_p7)
}
  0x12   :  { %s2400_s24 = smov 128   ;;  %s2401_s25 = smov 8  }
  0x13   :  { %34 = dma.hbm_to_vmem [thread:$0]  %s2684_s1, 8704, %s29_s13, [#allocation6], %s2400_s24, %s2400_s24, %s2401_s25  }
  0x14   :  { %s2326_s30 = scalar_lea.hbm %s2683_s0, 384 }
  0x15   :  { %p2327_p8 = scmp.ne.s32.totalorder %s2683_s0, %s2326_s30  ;;  %p2330_p9 = scmp.lt.u32.totalorder %s2326_s30, %s2683_s0 }
  0x17   :  { %p2332_p10 = pnand %p2330_p9, %p2327_p8 }
  0x19   :  { %2335 = shalt.err (!%p2332_p10)
}
  0x1a   :  { %s2336_s8 = scalar_lea.vmem %s2431_s15, 384  ;;  %p2341_p12 = scmp.lt.s32.totalorder %s2431_s15, %s2431_s15 }
  0x1b   :  { %p2337_p11 = scmp.ne.s32.totalorder %s2431_s15, %s2336_s8  ;;  %p2342_p13 = scmp.lt.s32.totalorder %s2336_s8, %s2336_s8 }
  0x1d   :  { %p2343_p0 = por %p2342_p13, %p2341_p12 }
  0x1f   :  { %p2344_p1 = pnand %p2343_p0, %p2337_p11 }
  0x21   :  { %2347 = shalt.err (!%p2344_p1)
}
  0x22   :  { %22 = dma.hbm_to_vmem [thread:$0]  %s2683_s0, 384, %s2431_s15, [#allocation3], %s2400_s24, %s2400_s24, %s2401_s25  }
  0x23   :  { %s2402_s10 = smov [#allocation7]   ;;  %s2348_s14 = scalar_lea.hbm %s2685_s2, 256 }
  0x24   :  { %s40_s11 = sshll.u32 %s2402_s10, 4  ;;  %p2349_p2 = scmp.ne.s32.totalorder %s2685_s2, %s2348_s14  ;;  %s41_s11 = int_to_ptr.vmem [resolvable:$true] %s40_s11 }
  0x25   :  { %p2352_p3 = scmp.lt.u32.totalorder %s2348_s14, %s2685_s2 }
  0x27   :  { %p2354_p4 = pnand %p2352_p3, %p2349_p2 }
  0x29   :  { %2357 = shalt.err (!%p2354_p4)
}
  0x2a   :  { %s2358_s20 = scalar_lea.vmem %s41_s11, 256  ;;  %p2363_p6 = scmp.lt.s32.totalorder %s41_s11, %s41_s11 }
  0x2b   :  { %p2359_p5 = scmp.ne.s32.totalorder %s41_s11, %s2358_s20  ;;  %p2364_p7 = scmp.lt.s32.totalorder %s2358_s20, %s2358_s20 }
  0x2d   :  { %p2365_p8 = por %p2364_p7, %p2363_p6 }
  0x2f   :  { %p2366_p9 = pnand %p2365_p8, %p2359_p5 }
  0x31   :  { %2369 = shalt.err (!%p2366_p9)
}
  0x32   :  { %46 = dma.hbm_to_vmem [thread:$0]  %s2685_s2, 256, %s41_s11, [#allocation6], %s2400_s24, %s2400_s24, %s2401_s25  }
  0x33   :  { %2392 = dma.done.wait [#allocation3], 384  }
  0x34   :  { %2393 = vsyncadd [#allocation3], 4294966912 }
  0x35   :  { %2394 = dma.done.wait [#allocation6], 8960  }
  0x36   :  { %2395 = vsyncadd [#allocation6], 4294958336  ;;  %vm69_vm0 = vcmask 261120   ;;  %v2483_v0 = vld [vmem:[#allocation2] sm:$0xff]  ;;  %v94_v7 = vld [vmem:[#allocation5] sm:$0xff]  ;;  %v2403_v10 = vmov 0.0|0.0  }
  0x37   :  { %v70_v1 = vsel %vm69_vm0, %v2483_v0, 0.0  ;;  %v95_v8 = vld [vmem:[#allocation5 + $0x8] sm:$0xff]  ;;  %v96_v9 = vld [vmem:[#allocation5 + $0x10] sm:$0xff]  ;;  %2107 = vmatprep.subr.bf16.mxu0 %v2403_v10  ;;  %v97_v12 = vld [vmem:[#allocation5 + $0x18] sm:$0xff]  ;;  %vm2404_vm1 = vmmov 0   ;;  %v2405_v13 = vmov 0.0   ;;  %2133 = vmatprep.subr.bf16.mxu1 %v2403_v10 }
  0x38   :  { %71 = vadd.xlane.f32.xlu0 %v70_v1  ;;  %v2108_v11 = vpack.c.bf16 %v95_v8, %v94_v7  ;;  %1891 = vmatprep.mubr.msk.f32.mxu0 %vm2404_vm1, %v2405_v13  ;;  %v2111_v14 = vpack.c.bf16 %v97_v12, %v96_v9  ;;  %v2497_v15 = vld [vmem:[#allocation5 + $0x1f0] sm:$0xff]  ;;  %v2499_v16 = vld [vmem:[#allocation5 + $0x1e0] sm:$0xff]  ;;  %s2406_s2 = smov 32   ;;  %v2503_v17 = vld [vmem:[#allocation5 + $0x1e8] sm:$0xff]  ;;  %s2407_s21 = smov 64   ;;  %vm665_vm3 = vcmask 64512  }
  0x39   :  { %1935 = vmatprep.mubr.msk.f32.mxu1 %vm2404_vm1, %v2405_v13  ;;  %185 = vrot.lane.b32.xlu1 %v2499_v16, %s2406_s2  ;;  %v2508_v18 = vld [vmem:[#allocation5 + $0x1f8] sm:$0xff]  ;;  %v1740_v23 = vld [vmem:[#allocation7] ss:$0 sm:$0xff]  ;;  %v1741_v25 = vld [vmem:[#allocation7 + $0x1] ss:$0 sm:$0xff]  ;;  %s2408_s22 = smov 96  }
  0x3a   :  { %2109 = vmatpush3.bf16.msra.mxu0 %v2108_v11  ;;  %v1742_v34 = vld [vmem:[#allocation7 + $0x2] ss:$0 sm:$0xff]  ;;  %vm2538_vm2 = vmpackc.low %vm69_vm0, %vm69_vm0  ;;  %vm895_vm4 = vcmask 516096   ;;  %vm924_vm5 = vcmask 523264   ;;  %s2410_s23 = smov [#allocation8]  }
  0x3b   :  { %2110 = vmatprep.subr.bf16.mxu0 %v2403_v10  ;;  %v63_v1 = vld [vmem:[#allocation5 + $0x200] sm:$0xff]  ;;  %s1730_s24 = sshll.u32 %s2410_s23, 4  ;;  %s1731_s24 = int_to_ptr.vmem [resolvable:$true] %s1730_s24 }
  0x3c   :  { %s2370_s25 = scalar_lea.vmem %s1731_s24, 128  ;;  %p2375_p11 = scmp.lt.s32.totalorder %s1731_s24, %s1731_s24 }
  0x3d   :  { %187 = vrot.lane.b32.xlu1 %v2503_v17, %s2406_s2  ;;  %p2371_p10 = scmp.ne.s32.totalorder %s1731_s24, %s2370_s25  ;;  %p2376_p12 = scmp.lt.s32.totalorder %s2370_s25, %s2370_s25 }
  0x3e   :  { %2112 = vmatpush3.bf16.msra.mxu0 %v2111_v14 }
  0x3f   :  { %2113 = vmatprep.subr.bf16.mxu0 %v2403_v10  ;;  %p2377_p13 = por %p2376_p12, %p2375_p11 }
  0x41   :  { %191 = vrot.lane.b32.xlu1 %v2508_v18, %s2406_s2  ;;  %p2378_p0 = pnand %p2377_p13, %p2371_p10 }
  0xab   :  { %v2522_v30 = vpop.permute.xlu1 %185 }
  0xaf   :  { %v2524_v32 = vpop.permute.xlu1 %187 }
  0xb3   :  { %v2526_v38 = vpop.permute.xlu1 %191 }
  0xc5   :  { %v72_v2 = vpop.xlane.xlu0 %71 }
  0xc6   :  { %v74_v3 = vmul.f32 0.03125, %v72_v2  ;;  %v64_v2 = vld [vmem:[#allocation5 + $0x208] sm:$0xff] }
  0xc8   :  { %v75_v4 = vsub.f32 %v2483_v0, %v74_v3  ;;  %v65_v3 = vld [vmem:[#allocation5 + $0x210] sm:$0xff] }
  0xca   :  { %v76_v5 = vmul.f32 %v75_v4, %v75_v4 }
  0xcc   :  { %v77_v6 = vsel %vm69_vm0, %v76_v5, 0.0  ;;  %v66_v5 = vld [vmem:[#allocation5 + $0x218] sm:$0xff] }
  0xcd   :  { %78 = vadd.xlane.f32.xlu0 %v77_v6  ;;  %v2555_v6 = vpack.c.bf16 %v66_v5, %v65_v3  ;;  %v58_v3 = vld [vmem:[#allocation2 + $0x10] sm:$0x1] }
  0xe3   :  { %189 = vrot.lane.b32.xlu0 %v2497_v15, %s2406_s2 }
  0xe7   :  { %201 = vrot.lane.b32.xlu0 %v2499_v16, %s2407_s21 }
  0xeb   :  { %203 = vrot.lane.b32.xlu0 %v2503_v17, %s2407_s21 }
  0xef   :  { %205 = vrot.lane.b32.xlu0 %v2497_v15, %s2407_s21 }
  0xf3   :  { %207 = vrot.lane.b32.xlu0 %v2508_v18, %s2407_s21 }
 0x15a   :  { %v79_v19 = vpop.xlane.xlu0 %78 }
 0x15b   :  { %v80_v20 = vmul.f32 0.03125, %v79_v19 }
 0x15d   :  { %v81_v21 = vadd.f32 1e-05, %v80_v20 }
 0x15e   :  { %v2520_v28 = vpop.permute.xlu0 %189 }
 0x15f   :  { %2280 = vrsqrt.f32 %v81_v21 }
 0x162   :  { %v202_v29 = vpop.permute.xlu0 %201 }
 0x166   :  { %v204_v31 = vpop.permute.xlu0 %203 }
 0x169   :  { %v2281_v22 = vpop.eup %2280 }
 0x16a   :  { %v83_v24 = vmul.f32 %v2281_v22, %v75_v4  ;;  %v206_v33 = vpop.permute.xlu0 %205  ;;  %v2552_v4 = vpack.c.bf16 %v64_v2, %v63_v1  ;;  %v742_v1 = vld [vmem:[#allocation5 + $0x78] sm:$0xff] }
 0x16c   :  { %v88_v26 = vmul.f32 %v1740_v23, %v83_v24 }
 0x16e   :  { %v93_v27 = vadd.f32 %v1741_v25, %v88_v26  ;;  %v208_v39 = vpop.permute.xlu0 %207  ;;  %v176_v25 = vld [vmem:[#allocation5 + $0x20] sm:$0xff]  ;;  %v177_v26 = vld [vmem:[#allocation5 + $0x28] sm:$0xff] }
 0x170   :  { %1892 = vmatmul.mubr.msk.f32.vlgmr.msra.gmra.mrb[0].mxu0 %vm69_vm0, %v93_v27  ;;  %v178_v27 = vld [vmem:[#allocation5 + $0x30] sm:$0xff] }
 0x171   :  { %1902 = vmatprep.mubr.msk.f32.mxu0 %vm2404_vm1, %v2405_v13 }
 0x243   :  { %v172_v35 = vpop.f32.mrb[0].mxu0 }
 0x244   :  { %v173_v36 = vadd.f32 %v1742_v34, %v172_v35  ;;  %v1893_v37 = vpop.f32.mrb[1].mxu0 }
 0x245   :  { %v584_v37 = vld [vmem:[#allocation5 + $0x48] sm:$0xff] }
 0x246   :  { %v197_v40 = vmul.f32 %v2522_v30, %v173_v36  ;;  %v198_v41 = vmul.f32 %v2524_v32, %v173_v36  ;;  %v213_v42 = vmul.f32 %v202_v29, %v173_v36  ;;  %v214_v43 = vmul.f32 %v204_v31, %v173_v36  ;;  %v179_v31 = vld [vmem:[#allocation5 + $0x38] sm:$0xff] }
 0x247   :  { %v199_v44 = vmul.f32 %v2520_v28, %v173_v36  ;;  %v200_v45 = vmul.f32 %v2526_v38, %v173_v36  ;;  %v215_v46 = vmul.f32 %v206_v33, %v173_v36  ;;  %v216_v47 = vmul.f32 %v208_v39, %v173_v36 }
 0x248   :  { %v2250_v48 = vpack.i.bf16 %v198_v41, %v197_v40  ;;  %v2260_v49 = vpack.i.bf16 %v214_v43, %v213_v42  ;;  %v2134_v29 = vpack.c.bf16 %v177_v26, %v176_v25  ;;  %v2137_v33 = vpack.c.bf16 %v179_v31, %v178_v27  ;;  %v585_v42 = vld [vmem:[#allocation5 + $0x50] sm:$0xff]  ;;  %v586_v43 = vld [vmem:[#allocation5 + $0x58] sm:$0xff]  ;;  %v1751_v27 = vld [vmem:[#allocation7 + $0x3] ss:$0 sm:$0xff] }
 0x249   :  { %v2255_v50 = vpack.i.bf16 %v200_v45, %v199_v44  ;;  %v2265_v51 = vpack.i.bf16 %v216_v47, %v215_v46  ;;  %v2143_v44 = vpack.c.bf16 %v586_v43, %v585_v42  ;;  %v57_v45 = vld [vmem:[#allocation2 + $0x8] sm:$0xff]  ;;  %v916_v43 = vld [vmem:[#allocation5 + $0xc8] sm:$0xff] }
 0x24a   :  { %2251 = vrot.lane.b32.xlu1 %v2250_v48, %s2408_s22  ;;  %2261 = vrot.lane.b32.xlu0 %v2260_v49, %s2407_s21  ;;  %v1755_v48 = vld [vmem:[#allocation7 + $0x6] ss:$0 sm:$0xff] }
 0x24b   :  { %2135 = vmatpush3.bf16.msra.mxu1 %v2134_v29 }
 0x24c   :  { %2136 = vmatprep.subr.bf16.mxu1 %v2403_v10 }
 0x24e   :  { %2256 = vrot.lane.b32.xlu1 %v2255_v50, %s2408_s22  ;;  %2266 = vrot.lane.b32.xlu0 %v2265_v51, %s2407_s21 }
 0x24f   :  { %2138 = vmatpush3.bf16.msra.mxu1 %v2137_v33 }
 0x250   :  { %1949 = vmatprep.subr.mxu1 %v2405_v13 }
 0x2bc   :  { %v2252_v52 = vpop.permute.xlu1 %2251  ;;  %v2262_v11 = vpop.permute.xlu0 %2261 }
 0x2bd   :  { %v2254_v53 = vunpack.i.h.bf16 %v2252_v52  ;;  %v2253_v54 = vunpack.i.l.bf16 %v2252_v52  ;;  %v2264_v12 = vunpack.i.h.bf16 %v2262_v11  ;;  %v2263_v14 = vunpack.i.l.bf16 %v2262_v11 }
 0x2be   :  { %v2409_v52 = vmov 0.125  }
 0x2bf   :  { %v2114_v56 = vpack.c.bf16 %v2254_v53, %v2253_v54  ;;  %v2128_v21 = vpack.c.bf16 %v2264_v12, %v2263_v14  ;;  %v743_v53 = vld [vmem:[#allocation5 + $0x80] sm:$0xff]  ;;  %v744_v54 = vld [vmem:[#allocation5 + $0x88] sm:$0xff] }
 0x2c0   :  { %v2257_v57 = vpop.permute.xlu1 %2256  ;;  %v2267_v19 = vpop.permute.xlu0 %2266 }
 0x2c1   :  { %2116 = vmatpush3.bf16.xpose.msk.msra.mxu0 %vm2538_vm2, %v2114_v56  ;;  %v2259_v58 = vunpack.i.h.bf16 %v2257_v57  ;;  %v2258_v59 = vunpack.i.l.bf16 %v2257_v57  ;;  %v2269_v22 = vunpack.i.h.bf16 %v2267_v19  ;;  %v2268_v23 = vunpack.i.l.bf16 %v2267_v19  ;;  %v739_v57 = vld [vmem:[#allocation5 + $0x60] sm:$0xff] }
 0x2c2   :  { %2117 = vmatprep.subr.bf16.mxu0 %v2403_v10  ;;  %v2146_v56 = vpack.c.bf16 %v744_v54, %v743_v53  ;;  %v893_v19 = vld [vmem:[#allocation7 + $0x7] sm:$0x1] }
 0x2c3   :  { %v2118_v60 = vpack.c.bf16 %v2259_v58, %v2258_v59  ;;  %v2131_v24 = vpack.c.bf16 %v2269_v22, %v2268_v23  ;;  %v740_v58 = vld [vmem:[#allocation5 + $0x68] sm:$0xff] }
 0x2c4   :  { %v2152_v59 = vpack.c.bf16 %v740_v58, %v739_v57  ;;  %v1760_v58 = vld [vmem:[#allocation7 + $0x8] ss:$0 sm:$0xff] }
 0x2c9   :  { %2120 = vmatpush3.bf16.xpose.msk.msra.mxu0 %vm2538_vm2, %v2118_v60  ;;  %v745_v60 = vld [vmem:[#allocation5 + $0x90] sm:$0xff] }
 0x2ca   :  { %2121 = vmatprep.subr.bf16.mxu0 %v2403_v10 }
 0x2d0   :  { %1903 = vmatmul.mubr.msk.f32.vlgmr.msra.gmra.mrb[2].mxu0 %vm69_vm0, %v173_v36  ;;  %v583_v36 = vld [vmem:[#allocation5 + $0x40] sm:$0xff] }
 0x2d1   :  { %1913 = vmatprep.mubr.msk.f32.mxu0 %vm2404_vm1, %v2405_v13  ;;  %2123 = vmatpush3.bf16.msra.mxu0 %v2552_v4  ;;  %v2140_v40 = vpack.c.bf16 %v584_v37, %v583_v36  ;;  %v911_v36 = vld [vmem:[#allocation5 + $0xa0] sm:$0xff]  ;;  %v912_v37 = vld [vmem:[#allocation5 + $0xa8] sm:$0xff] }
 0x2d2   :  { %2124 = vmatprep.subr.bf16.mxu0 %v2403_v10 }
 0x2d5   :  { %2126 = vmatpush3.bf16.msra.mxu0 %v2555_v6 }
 0x2d6   :  { %2127 = vmatprep.subr.bf16.mxu0 %v2403_v10 }
 0x3a3   :  { %v306_v61 = vpop.f32.mrb[2].mxu0 }
 0x3a4   :  { %v1904_v62 = vpop.f32.mrb[3].mxu0  ;;  %v310_v63 = vsel %vm69_vm0, %v306_v61, -inf }
 0x3a5   :  { %311 = vmax.xlane.f32.xlu1 %v310_v63  ;;  %v741_v62 = vld [vmem:[#allocation5 + $0x70] sm:$0xff] }
 0x3a6   :  { %v2155_v2 = vpack.c.bf16 %v742_v1, %v741_v62 }
 0x432   :  { %v312_v7 = vpop.xlane.xlu1 %311 }
 0x433   :  { %v313_v8 = vsub.f32 %v306_v61, %v312_v7  ;;  %v746_v61 = vld [vmem:[#allocation5 + $0x98] sm:$0xff] }
 0x434   :  { %v2149_v63 = vpack.c.bf16 %v746_v61, %v745_v60 }
 0x435   :  { %v314_v9 = vmul.f32 1.442695, %v313_v8 }
 0x437   :  { %2282 = vpow2.f32 %v314_v9 }
 0x441   :  { %v2283_v20 = vpop.eup %2282 }
 0x442   :  { %1914 = vmatmul.mubr.msk.f32.vlgmr.msra.gmra.mrb[4].mxu0 %vm69_vm0, %v2283_v20 }
 0x443   :  { %2129 = vmatpush3.bf16.msra.mxu0 %v2128_v21  ;;  %1924 = vmatprep.mubr.msk.f32.mxu0 %vm2404_vm1, %v2405_v13 }
 0x444   :  { %2130 = vmatprep.subr.bf16.mxu0 %v2403_v10 }
 0x447   :  { %2132 = vmatpush3.bf16.msra.mxu0 %v2131_v24 }
 0x448   :  { %2139 = vmatprep.subr.bf16.mxu0 %v2403_v10 }
 0x515   :  { %v385_v34 = vpop.f32.mrb[4].mxu0 }
 0x516   :  { %2284 = vrcp.f32 %v385_v34  ;;  %v1915_v35 = vpop.f32.mrb[5].mxu0 }
 0x520   :  { %v2285_v39 = vpop.eup %2284 }
 0x521   :  { %v390_v41 = vmul.f32 %v2285_v39, %v2283_v20  ;;  %v2158_v39 = vpack.c.bf16 %v912_v37, %v911_v36  ;;  %v1092_v36 = vld [vmem:[#allocation5 + $0x108] sm:$0xff] }
 0x523   :  { %1925 = vmatmul.mubr.msk.f32.vlgmr.msra.gmra.mrb[6].mxu0 %vm69_vm0, %v390_v41  ;;  %v914_v41 = vld [vmem:[#allocation5 + $0xb8] sm:$0xff] }
 0x524   :  { %2141 = vmatpush3.bf16.msra.mxu0 %v2140_v40  ;;  %1946 = vmatprep.mubr.msk.f32.mxu0 %vm2404_vm1, %v2405_v13  ;;  %v913_v40 = vld [vmem:[#allocation5 + $0xb0] sm:$0xff] }
 0x525   :  { %2142 = vmatprep.subr.bf16.mxu0 %v2403_v10  ;;  %v2161_v42 = vpack.c.bf16 %v914_v41, %v913_v40  ;;  %v1094_v40 = vld [vmem:[#allocation5 + $0x118] sm:$0xff] }
 0x528   :  { %2144 = vmatpush3.bf16.msra.mxu0 %v2143_v44 }
 0x529   :  { %2151 = vmatprep.subr.bf16.mxu0 %v2403_v10 }
 0x52b   :  { %1947 = vmatmul.mubr.msk.f32.vlgmr.msra.gmra.mrb[8].mxu0 %vm69_vm0, %v57_v45  ;;  %v917_v45 = vld [vmem:[#allocation5 + $0xd0] sm:$0xff] }
 0x52c   :  { %1973 = vmatprep.mubr.msk.f32.mxu0 %vm2404_vm1, %v2405_v13  ;;  %2153 = vmatpush3.bf16.msra.mxu0 %v2152_v59 }
 0x52d   :  { %2154 = vmatprep.subr.bf16.mxu0 %v2403_v10 }
 0x530   :  { %2156 = vmatpush3.bf16.msra.mxu0 %v2155_v2 }
 0x531   :  { %2169 = vmatprep.subr.bf16.mxu0 %v2403_v10 }
 0x5f6   :  { %v476_v46 = vpop.f32.mrb[6].mxu0 }
 0x5f7   :  { %v1926_v47 = vpop.f32.mrb[7].mxu0  ;;  %1936 = vmatmul.mubr.msk.f32.vlgmr.msra.gmra.mrb[0].mxu1 %vm69_vm0, %v476_v46  ;;  %v918_v46 = vld [vmem:[#allocation5 + $0xd8] sm:$0xff] }
 0x5f8   :  { %1951 = vmatprep.mubr.msk.f32.mxu1 %vm2404_vm1, %v2405_v13  ;;  %v2167_v47 = vpack.c.bf16 %v918_v46, %v917_v45 }
 0x5fe   :  { %v661_v49 = vpop.f32.mrb[8].mxu0 }
 0x5ff   :  { %v662_v50 = vadd.f32 %v1755_v48, %v661_v49  ;;  %v1948_v51 = vpop.f32.mrb[9].mxu0  ;;  %v907_v49 = vlaneseq }
 0x601   :  { %1950 = vmatpush3.msra.mxu1 %v662_v50  ;;  %v908_v50 = vshrl.u32 %v907_v49, 7 }
 0x602   :  { %1952 = vmatmul.mubr.msk.f32.vlgmr.msra.gmra.mrb[2].mxu1 %vm665_vm3, %v2409_v52  ;;  %2145 = vmatprep.subr.bf16.mxu1 %v2403_v10 }
 0x603   :  { %1962 = vmatprep.mubr.msk.f32.mxu1 %vm2404_vm1, %v2405_v13  ;;  %2147 = vmatpush3.bf16.msra.mxu1 %v2146_v56  ;;  %v909_v51 = vsub.s32 0, %v908_v50 }
 0x604   :  { %2148 = vmatprep.subr.bf16.mxu1 %v2403_v10 }
 0x607   :  { %2150 = vmatpush3.bf16.msra.mxu1 %v2149_v63 }
 0x608   :  { %2157 = vmatprep.subr.bf16.mxu1 %v2403_v10 }
 0x60a   :  { %1963 = vmatmul.mubr.msk.f32.vlgmr.msra.gmra.mrb[4].mxu1 %vm69_vm0, %v58_v3  ;;  %v1009_v3 = vld [vmem:[#allocation5 + $0xe0] sm:$0xff] }
 0x60b   :  { %1992 = vmatprep.mubr.msk.f32.mxu1 %vm2404_vm1, %v2405_v13  ;;  %2159 = vmatpush3.bf16.msra.mxu1 %v2158_v39  ;;  %v1093_v39 = vld [vmem:[#allocation5 + $0x110] sm:$0xff] }
 0x60c   :  { %2160 = vmatprep.subr.bf16.mxu1 %v2403_v10  ;;  %v2179_v41 = vpack.c.bf16 %v1094_v40, %v1093_v39 }
 0x60f   :  { %2162 = vmatpush3.bf16.msra.mxu1 %v2161_v42 }
 0x610   :  { %2163 = vmatprep.subr.bf16.mxu1 %v2403_v10 }
 0x6ca   :  { %v553_v5 = vpop.f32.mrb[0].mxu1 }
 0x6cb   :  { %v1937_v7 = vpop.f32.mrb[1].mxu1  ;;  %v554_v29 = vadd.f32 %v1751_v27, %v553_v5  ;;  %v1010_v5 = vld [vmem:[#allocation5 + $0xe8] sm:$0xff] }
 0x6cc   :  { %v2170_v7 = vpack.c.bf16 %v1010_v5, %v1009_v3 }
 0x6cd   :  { %v2592_v33 = vadd.f32 %v554_v29, %v2483_v0  ;;  %v915_v0 = vld [vmem:[#allocation5 + $0xc0] sm:$0xff] }
 0x6ce   :  { %v2164_v44 = vpack.c.bf16 %v916_v43, %v915_v0  ;;  %v1754_v29 = vld [vmem:[#allocation7 + $0x5] ss:$0 sm:$0xff] }
 0x6cf   :  { %v560_v35 = vsel %vm69_vm0, %v2592_v33, 0.0 }
 0x6d0   :  { %2165 = vmatpush3.bf16.msra.mxu1 %v2164_v44  ;;  %v1762_v44 = vld [vmem:[#allocation7 + $0x9] ss:$0 sm:$0xff] }
 0x6d1   :  { %2166 = vmatprep.subr.bf16.mxu1 %v2403_v10 }
 0x6d4   :  { %2168 = vmatpush3.bf16.msra.mxu1 %v2167_v47 }
 0x6d5   :  { %v735_v8 = vpop.f32.mrb[2].mxu1  ;;  %2181 = vmatprep.subr.bf16.mxu1 %v2403_v10 }
 0x6d6   :  { %1974 = vmatmul.mubr.msk.f32.vlgmr.msra.gmra.mrb[10].mxu0 %vm69_vm0, %v735_v8  ;;  %v1953_v9 = vpop.f32.mrb[3].mxu1  ;;  %v1011_v8 = vld [vmem:[#allocation5 + $0xf0] sm:$0xff] }
 0x6d7   :  { %2003 = vmatprep.mubr.msk.f32.mxu0 %vm2404_vm1, %v2405_v13  ;;  %2171 = vmatpush3.bf16.msra.mxu0 %v2170_v7  ;;  %v1012_v9 = vld [vmem:[#allocation5 + $0xf8] sm:$0xff] }
 0x6d8   :  { %2172 = vmatprep.subr.bf16.mxu0 %v2403_v10 }
 0x6dd   :  { %v816_v11 = vpop.f32.mrb[4].mxu1 }
 0x6de   :  { %v1964_v12 = vpop.f32.mrb[5].mxu1 }
 0x7a9   :  { %v889_v14 = vpop.f32.mrb[10].mxu0 }
 0x7aa   :  { %v890_v20 = vadd.f32 %v889_v14, %v816_v11  ;;  %v1975_v21 = vpop.f32.mrb[11].mxu0  ;;  %v2173_v11 = vpack.c.bf16 %v1012_v9, %v1011_v8  ;;  %v1174_v9 = vld [vmem:[#allocation5 + $0x128] sm:$0xff] }
 0x7ac   :  { %v894_v22 = vadd.f32 %v893_v19, %v890_v20  ;;  %2174 = vmatpush3.bf16.msra.mxu0 %v2173_v11  ;;  %v1175_v11 = vld [vmem:[#allocation5 + $0x130] sm:$0xff] }
 0x7ad   :  { %2175 = vmatprep.subr.bf16.mxu0 %v2403_v10 }
 0x7ae   :  { %v896_v23 = vsel %vm895_vm4, %v894_v22, -inf }
 0x7af   :  { %897 = vmax.xlane.f32.xlu0 %v896_v23 }
 0x83c   :  { %v898_v24 = vpop.xlane.xlu0 %897 }
 0x83d   :  { %v899_v25 = vsub.f32 %v894_v22, %v898_v24 }
 0x83f   :  { %v900_v26 = vmul.f32 1.442695, %v899_v25 }
 0x841   :  { %2286 = vpow2.f32 %v900_v26  ;;  %v1753_v26 = vld [vmem:[#allocation7 + $0x4] ss:$0 sm:$0xff] }
 0x84b   :  { %v2287_v31 = vpop.eup %2286 }
 0x84c   :  { %v902_v34 = vsel %vm895_vm4, %v2287_v31, 0.0 }
 0x84d   :  { %903 = vadd.xlane.f32.xlu1 %v902_v34 }
 0x851   :  { %561 = vadd.xlane.f32.xlu1 %v560_v35  ;;  %v1091_v35 = vld [vmem:[#allocation5 + $0x100] sm:$0xff] }
 0x852   :  { %v2176_v37 = vpack.c.bf16 %v1092_v36, %v1091_v35 }
 0x8da   :  { %v904_v48 = vpop.xlane.xlu1 %903 }
 0x8db   :  { %2288 = vrcp.f32 %v904_v48 }
 0x8de   :  { %v562_v56 = vpop.xlane.xlu1 %561 }
 0x8df   :  { %v563_v57 = vmul.f32 0.03125, %v562_v56 }
 0x8e1   :  { %v564_v59 = vsub.f32 %v2592_v33, %v563_v57 }
 0x8e3   :  { %v565_v1 = vmul.f32 %v564_v59, %v564_v59 }
 0x8e5   :  { %v2289_v52 = vpop.eup %2288  ;;  %v566_v2 = vsel %vm69_vm0, %v565_v1, 0.0 }
 0x8e6   :  { %v906_v53 = vmul.f32 %v2289_v52, %v2287_v31 }
 0x8e8   :  { %v910_v54 = vrot.slane %v906_v53, %v909_v51 }
 0x8ea   :  { %1993 = vmatmul.mubr.msk.f32.vlgmr.msra.gmra.mrb[6].mxu1 %vm924_vm5, %v910_v54 }
 0x8eb   :  { %2025 = vmatprep.mubr.msk.f32.mxu1 %vm2404_vm1, %v2405_v13 }
 0x9bd   :  { %v994_v60 = vpop.f32.mrb[6].mxu1 }
 0x9be   :  { %v995_v61 = vadd.f32 %v1760_v58, %v994_v60  ;;  %v1994_v62 = vpop.f32.mrb[7].mxu1 }
 0x9c0   :  { %v998_v63 = vsel %vm69_vm0, %v995_v61, -inf }
 0x9c1   :  { %999 = vmax.xlane.f32.xlu1 %v998_v63 }
 0x9c5   :  { %567 = vadd.xlane.f32.xlu1 %v566_v2 }
 0xa4e   :  { %v1000_v12 = vpop.xlane.xlu1 %999 }
 0xa4f   :  { %v1001_v14 = vsub.f32 %v995_v61, %v1000_v12 }
 0xa51   :  { %v1002_v19 = vmul.f32 1.442695, %v1001_v14  ;;  %v1176_v14 = vld [vmem:[#allocation5 + $0x138] sm:$0xff] }
 0xa52   :  { %v568_v20 = vpop.xlane.xlu1 %567 }
 0xa53   :  { %2290 = vpow2.f32 %v1002_v19  ;;  %v569_v21 = vmul.f32 0.03125, %v568_v20  ;;  %v2205_v19 = vpack.c.bf16 %v1176_v14, %v1175_v11 }
 0xa55   :  { %v570_v22 = vadd.f32 1e-05, %v569_v21 }
 0xa57   :  { %2292 = vrsqrt.f32 %v570_v22 }
 0xa5d   :  { %v2291_v23 = vpop.eup %2290 }
 0xa5e   :  { %v1004_v24 = vsel %vm69_vm0, %v2291_v23, 0.0 }
 0xa5f   :  { %1005 = vadd.xlane.f32.xlu1 %v1004_v24 }
 0xa61   :  { %v2293_v25 = vpop.eup %2292 }
 0xa62   :  { %v572_v27 = vmul.f32 %v2293_v25, %v564_v59 }
 0xa64   :  { %v577_v31 = vmul.f32 %v1753_v26, %v572_v27  ;;  %v1773_v26 = vld [vmem:[#allocation7 + $0xb] ss:$0 sm:$0xff] }
 0xa66   :  { %v582_v34 = vadd.f32 %v1754_v29, %v577_v31 }
 0xa68   :  { %2004 = vmatmul.mubr.msk.f32.vlgmr.msra.gmra.mrb[12].mxu0 %vm69_vm0, %v582_v34 }
 0xa69   :  { %2014 = vmatprep.mubr.msk.f32.mxu0 %vm2404_vm1, %v2405_v13  ;;  %2177 = vmatpush3.bf16.msra.mxu0 %v2176_v37 }
 0xa6a   :  { %2178 = vmatprep.subr.bf16.mxu0 %v2403_v10 }
 0xa6d   :  { %2180 = vmatpush3.bf16.msra.mxu0 %v2179_v41 }
 0xa6e   :  { %2189 = vmatprep.subr.bf16.mxu0 %v2403_v10 }
 0xaec   :  { %v1006_v42 = vpop.xlane.xlu1 %1005 }
 0xaed   :  { %2294 = vrcp.f32 %v1006_v42  ;;  %v1545_v42 = vld [vmem:[#allocation5 + $0x148] sm:$0xff] }
 0xaf7   :  { %v2295_v0 = vpop.eup %2294 }
 0xaf8   :  { %v1008_v43 = vmul.f32 %v2295_v0, %v2291_v23 }
 0xafa   :  { %2015 = vmatmul.mubr.msk.f32.vlgmr.msra.gmra.mrb[14].mxu0 %vm69_vm0, %v1008_v43  ;;  %v1547_v43 = vld [vmem:[#allocation5 + $0x158] sm:$0xff] }
 0xafb   :  { %2191 = vmatpush3.bf16.msra.mxu0 %v2552_v4  ;;  %2036 = vmatprep.mubr.msk.f32.mxu0 %vm2404_vm1, %v2405_v13  ;;  %v1764_v4 = vld [vmem:[#allocation7 + $0xa] ss:$0 sm:$0xff] }
 0xafc   :  { %2192 = vmatprep.subr.bf16.mxu0 %v2403_v10 }
 0xaff   :  { %2194 = vmatpush3.bf16.msra.mxu0 %v2555_v6 }
 0xb00   :  { %2195 = vmatprep.subr.bf16.mxu0 %v2403_v10 }
 0xb3b   :  { %v1087_v45 = vpop.f32.mrb[12].mxu0 }
 0xb3c   :  { %v1088_v46 = vadd.f32 %v1762_v44, %v1087_v45  ;;  %v2005_v47 = vpop.f32.mrb[13].mxu0  ;;  %v1631_v45 = vld [vmem:[#allocation5 + $0x160] sm:$0xff] }
 0xb3d   :  { %v1633_v47 = vld [vmem:[#allocation5 + $0x170] sm:$0xff] }
 0xb3e   :  { %v1184_v48 = vmul.f32 %v1088_v46, %v2520_v28  ;;  %v1185_v49 = vmul.f32 %v1088_v46, %v2526_v38 }
 0xb40   :  { %v2275_v50 = vpack.i.bf16 %v1185_v49, %v1184_v48  ;;  %v1634_v49 = vld [vmem:[#allocation5 + $0x178] sm:$0xff] }
 0xb42   :  { %2276 = vrot.lane.b32.xlu0 %v2275_v50, %s2408_s22  ;;  %v2217_v50 = vpack.c.bf16 %v1634_v49, %v1633_v47 }
 0xbb4   :  { %v2277_v2 = vpop.permute.xlu0 %2276 }
 0xbb5   :  { %v2279_v5 = vunpack.i.h.bf16 %v2277_v2  ;;  %v2278_v7 = vunpack.i.l.bf16 %v2277_v2  ;;  %v1644_v2 = vld [vmem:[#allocation5 + $0x1c8] sm:$0xff] }
 0xbcd   :  { %v1169_v51 = vpop.f32.mrb[14].mxu0 }
 0xbce   :  { %v1170_v52 = vadd.f32 %v1764_v4, %v1169_v51  ;;  %v2016_v53 = vpop.f32.mrb[15].mxu0  ;;  %v1635_v4 = vld [vmem:[#allocation5 + $0x180] sm:$0xff]  ;;  %v1636_v51 = vld [vmem:[#allocation5 + $0x188] sm:$0xff] }
 0xbd0   :  { %v1178_v54 = vmul.f32 %v1170_v52, %v2499_v16  ;;  %v1179_v6 = vmul.f32 %v1170_v52, %v2503_v17  ;;  %v1180_v28 = vmul.f32 %v1170_v52, %v2497_v15  ;;  %v1181_v38 = vmul.f32 %v1170_v52, %v2508_v18 }
 0xbd1   :  { %v1182_v15 = vmul.f32 %v1088_v46, %v2522_v30  ;;  %v1183_v18 = vmul.f32 %v1088_v46, %v2524_v32  ;;  %v2199_v30 = vpack.c.bf16 %v2279_v5, %v2278_v7  ;;  %v1173_v32 = vld [vmem:[#allocation5 + $0x120] sm:$0xff]  ;;  %v2220_v52 = vpack.c.bf16 %v1636_v51, %v1635_v4  ;;  %v1645_v5 = vld [vmem:[#allocation5 + $0x1d0] sm:$0xff]  ;;  %v1646_v7 = vld [vmem:[#allocation5 + $0x1d8] sm:$0xff] }
 0xbd2   :  { %v2182_v56 = vpack.c.bf16 %v1179_v6, %v1178_v54  ;;  %v2186_v57 = vpack.c.bf16 %v1181_v38, %v1180_v28  ;;  %v2202_v12 = vpack.c.bf16 %v1174_v9, %v1173_v32  ;;  %v1775_v28 = vld [vmem:[#allocation7 + $0xc] ss:$0 sm:$0xff] }
 0xbd3   :  { %v2270_v59 = vpack.i.bf16 %v1183_v18, %v1182_v15  ;;  %v1638_v15 = vld [vmem:[#allocation5 + $0x198] sm:$0xff] }
 0xbd4   :  { %2184 = vmatpush3.bf16.xpose.msk.msra.mxu1 %vm2538_vm2, %v2182_v56 }
 0xbd5   :  { %2185 = vmatprep.subr.bf16.mxu1 %v2403_v10 }
 0xbdc   :  { %2188 = vmatpush3.bf16.xpose.msk.msra.mxu1 %vm2538_vm2, %v2186_v57  ;;  %v1776_v57 = vld [vmem:[#allocation7 + $0xd] ss:$0 sm:$0xff] }
 0xbdd   :  { %2201 = vmatprep.subr.bf16.mxu1 %v2403_v10 }
 0xbe3   :  { %2026 = vmatmul.mubr.msk.f32.vlgmr.msra.gmra.mrb[8].mxu1 %vm69_vm0, %v1088_v46  ;;  %v1632_v46 = vld [vmem:[#allocation5 + $0x168] sm:$0xff] }
 0xbe4   :  { %2058 = vmatprep.mubr.msk.f32.mxu1 %vm2404_vm1, %v2405_v13  ;;  %2203 = vmatpush3.bf16.msra.mxu1 %v2202_v12  ;;  %v2214_v48 = vpack.c.bf16 %v1632_v46, %v1631_v45 }
 0xbe5   :  { %2204 = vmatprep.subr.bf16.mxu1 %v2403_v10 }
 0xbe8   :  { %2206 = vmatpush3.bf16.msra.mxu1 %v2205_v19 }
 0xbe9   :  { %2213 = vmatprep.subr.bf16.mxu1 %v2403_v10 }
 0xcb6   :  { %v1267_v16 = vpop.f32.mrb[8].mxu1 }
 0xcb7   :  { %v2027_v17 = vpop.f32.mrb[9].mxu1  ;;  %v1271_v58 = vsel %vm69_vm0, %v1267_v16, -inf }
 0xcb8   :  { %1272 = vmax.xlane.f32.xlu1 %v1271_v58  ;;  %v1637_v58 = vld [vmem:[#allocation5 + $0x190] sm:$0xff] }
 0xcb9   :  { %v2223_v18 = vpack.c.bf16 %v1638_v15, %v1637_v58 }
 0xcc9   :  { %2271 = vrot.lane.b32.xlu1 %v2270_v59, %s2408_s22  ;;  %v1639_v59 = vld [vmem:[#allocation5 + $0x1a0] sm:$0xff] }
 0xd45   :  { %v1273_v55 = vpop.xlane.xlu1 %1272 }
 0xd46   :  { %v1274_v60 = vsub.f32 %v1267_v16, %v1273_v55  ;;  %v1640_v55 = vld [vmem:[#allocation5 + $0x1a8] sm:$0xff] }
 0xd48   :  { %v1275_v61 = vmul.f32 1.442695, %v1274_v60  ;;  %v2226_v60 = vpack.c.bf16 %v1640_v55, %v1639_v59 }
 0xd49   :  { %v2272_v62 = vpop.permute.xlu1 %2271 }
 0xd4a   :  { %2296 = vpow2.f32 %v1275_v61  ;;  %v2274_v63 = vunpack.i.h.bf16 %v2272_v62  ;;  %v2273_v1 = vunpack.i.l.bf16 %v2272_v62  ;;  %v1641_v61 = vld [vmem:[#allocation5 + $0x1b0] sm:$0xff]  ;;  %v1642_v62 = vld [vmem:[#allocation5 + $0x1b8] sm:$0xff] }
 0xd4c   :  { %v2196_v8 = vpack.c.bf16 %v2274_v63, %v2273_v1  ;;  %v2229_v63 = vpack.c.bf16 %v1642_v62, %v1641_v61  ;;  %v1643_v1 = vld [vmem:[#allocation5 + $0x1c0] sm:$0xff] }
 0xd54   :  { %v2297_v3 = vpop.eup %2296 }
 0xd55   :  { %2037 = vmatmul.mubr.msk.f32.vlgmr.msra.gmra.mrb[16].mxu0 %vm69_vm0, %v2297_v3 }
 0xd56   :  { %2197 = vmatpush3.bf16.msra.mxu0 %v2196_v8  ;;  %2047 = vmatprep.mubr.msk.f32.mxu0 %vm2404_vm1, %v2405_v13  ;;  %v2235_v8 = vpack.c.bf16 %v1646_v7, %v1645_v5 }
 0xd57   :  { %2198 = vmatprep.subr.bf16.mxu0 %v2403_v10 }
 0xd5a   :  { %2200 = vmatpush3.bf16.msra.mxu0 %v2199_v30  ;;  %v1777_v30 = vld [vmem:[#allocation7 + $0xe] ss:$0 sm:$0xff] }
 0xd5b   :  { %2207 = vmatprep.subr.bf16.mxu0 %v2403_v10 }
 0xe28   :  { %v1346_v20 = vpop.f32.mrb[16].mxu0 }
 0xe29   :  { %2298 = vrcp.f32 %v1346_v20  ;;  %v2038_v21 = vpop.f32.mrb[17].mxu0 }
 0xe33   :  { %v2299_v22 = vpop.eup %2298 }
 0xe34   :  { %v1351_v23 = vmul.f32 %v2299_v22, %v2297_v3  ;;  %v2232_v3 = vpack.c.bf16 %v1644_v2, %v1643_v1  ;;  %v1779_v22 = vld [vmem:[#allocation7 + $0xf] ss:$0 sm:$0xff] }
 0xe36   :  { %2048 = vmatmul.mubr.msk.f32.vlgmr.msra.gmra.mrb[18].mxu0 %vm69_vm0, %v1351_v23 }
 0xe37   :  { %2069 = vmatprep.mubr.msk.f32.mxu0 %vm2404_vm1, %v2405_v13 }
 0xf09   :  { %v1437_v24 = vpop.f32.mrb[18].mxu0 }
 0xf0a   :  { %v2049_v25 = vpop.f32.mrb[19].mxu0  ;;  %2059 = vmatmul.mubr.msk.f32.vlgmr.msra.gmra.mrb[10].mxu1 %vm69_vm0, %v1437_v24 }
 0xf0b   :  { %2104 = vmatprep.mubr.msk.f32.mxu1 %vm2404_vm1, %v2405_v13  ;;  %v1544_v13 = vld [vmem:[#allocation5 + $0x140] sm:$0xff]  ;;  %2215 = vmatpush3.bf16.msra.mxu1 %v2214_v48 }
 0xf0c   :  { %v2208_v0 = vpack.c.bf16 %v1545_v42, %v1544_v13  ;;  %2216 = vmatprep.subr.bf16.mxu1 %v2403_v10 }
 0xf0e   :  { %2209 = vmatpush3.bf16.msra.mxu0 %v2208_v0 }
 0xf0f   :  { %2210 = vmatprep.subr.bf16.mxu0 %v2403_v10  ;;  %2218 = vmatpush3.bf16.msra.mxu1 %v2217_v50 }
 0xf10   :  { %2219 = vmatprep.subr.bf16.mxu1 %v2403_v10 }
 0xf13   :  { %2221 = vmatpush3.bf16.msra.mxu1 %v2220_v52 }
 0xf14   :  { %2222 = vmatprep.subr.bf16.mxu1 %v2403_v10 }
 0xf17   :  { %2224 = vmatpush3.bf16.msra.mxu1 %v2223_v18 }
 0xf18   :  { %2225 = vmatprep.subr.bf16.mxu1 %v2403_v10 }
 0xf1b   :  { %2227 = vmatpush3.bf16.msra.mxu1 %v2226_v60 }
 0xf1c   :  { %2228 = vmatprep.subr.bf16.mxu1 %v2403_v10 }
 0xf1f   :  { %2230 = vmatpush3.bf16.msra.mxu1 %v2229_v63 }
 0xf20   :  { %2231 = vmatprep.subr.bf16.mxu1 %v2403_v10 }
 0xf23   :  { %2233 = vmatpush3.bf16.msra.mxu1 %v2232_v3 }
 0xf24   :  { %2234 = vmatprep.subr.bf16.mxu1 %v2403_v10 }
 0xf27   :  { %2236 = vmatpush3.bf16.msra.mxu1 %v2235_v8 }
 0xfdd   :  { %v1514_v27 = vpop.f32.mrb[10].mxu1 }
 0xfde   :  { %v1515_v29 = vadd.f32 %v1773_v26, %v1514_v27  ;;  %v2060_v31 = vpop.f32.mrb[11].mxu1 }
 0xfe0   :  { %v2654_v34 = vadd.f32 %v1515_v29, %v2592_v33  ;;  %v1546_v33 = vld [vmem:[#allocation5 + $0x150] sm:$0xff] }
 0xfe1   :  { %v2211_v44 = vpack.c.bf16 %v1547_v43, %v1546_v33 }
 0xfe2   :  { %v1521_v35 = vsel %vm69_vm0, %v2654_v34, 0.0 }
 0xfe3   :  { %1522 = vadd.xlane.f32.xlu1 %v1521_v35  ;;  %2212 = vmatpush3.bf16.msra.mxu0 %v2211_v44 }
0x1070   :  { %v1523_v36 = vpop.xlane.xlu1 %1522 }
0x1071   :  { %v1524_v37 = vmul.f32 0.03125, %v1523_v36 }
0x1073   :  { %v1525_v39 = vsub.f32 %v2654_v34, %v1524_v37 }
0x1075   :  { %v1526_v40 = vmul.f32 %v1525_v39, %v1525_v39 }
0x1077   :  { %v1527_v41 = vsel %vm69_vm0, %v1526_v40, 0.0 }
0x1078   :  { %1528 = vadd.xlane.f32.xlu0 %v1527_v41 }
0x1105   :  { %v1529_v53 = vpop.xlane.xlu0 %1528 }
0x1106   :  { %v1530_v54 = vmul.f32 0.03125, %v1529_v53 }
0x1108   :  { %v1531_v6 = vadd.f32 1e-05, %v1530_v54 }
0x110a   :  { %2300 = vrsqrt.f32 %v1531_v6 }
0x1114   :  { %v2301_v56 = vpop.eup %2300 }
0x1115   :  { %v1533_v38 = vmul.f32 %v2301_v56, %v1525_v39 }
0x1117   :  { %v1538_v16 = vmul.f32 %v1775_v28, %v1533_v38 }
0x1119   :  { %v1543_v17 = vadd.f32 %v1776_v57, %v1538_v16 }
0x111b   :  { %2070 = vmatmul.mubr.msk.f32.vlgmr.msra.gmra.mrb[20].mxu0 %vm69_vm0, %v1543_v17 }
0x11ee   :  { %v1622_v32 = vpop.f32.mrb[20].mxu0 }
0x11ef   :  { %v1623_v9 = vadd.f32 %v1777_v30, %v1622_v32  ;;  %v2071_v11 = vpop.f32.mrb[21].mxu0 }
0x11f1   :  { %v1627_v12 = vmul.f32 0.70710677, %v1623_v9  ;;  %v1626_v19 = vmul.f32 0.5, %v1623_v9 }
0x11f3   :  { %2302 = verf.f32 %v1627_v12 }
0x11fd   :  { %v2303_v14 = vpop.eup %2302 }
0x11fe   :  { %v1629_v20 = vadd.f32 1.0, %v2303_v14 }
0x1200   :  { %v1630_v21 = vmul.f32 %v1629_v20, %v1626_v19 }
0x1202   :  { %2105 = vmatmul.mubr.f32.vlgmr.msra.gmra.mrb[12].mxu1 %v1630_v21 }
0x12d5   :  { %v1718_v23 = vpop.f32.mrb[12].mxu1 }
0x12d6   :  { %v1719_v10 = vadd.f32 %v1779_v22, %v1718_v23  ;;  %v2106_v24 = vpop.f32.mrb[13].mxu1 }
0x12d8   :  { %v1722_v25 = vadd.f32 %v1719_v10, %v2654_v34 }
0x12da   :  { %1723 = vst.msk [vmem:[#allocation8] sm:$0xff] %vm69_vm0, %v1722_v25 }
0x12db   :  { %2381 = shalt.err (!%p2378_p0)
}
0x12dc   :  { %s2382_s28 = scalar_lea.hbm %s2686_s3, 128 }
0x12dd   :  { %p2383_p1 = scmp.ne.s32.totalorder %s2686_s3, %s2382_s28  ;;  %p2386_p2 = scmp.lt.u32.totalorder %s2382_s28, %s2686_s3 }
0x12df   :  { %p2388_p3 = pnand %p2386_p2, %p2383_p1 }
0x12e1   :  { %2391 = shalt.err (!%p2388_p3)
}
0x12e2   :  { %1733 = dma.vmem_to_hbm [thread:$0]  %s1731_s24, 128, %s2686_s3, [#allocation4]  }
0x12e3   :  { %2396 = dma.done.wait [#allocation4], 128  }
0x12e4   :  { %2397 = vsyncadd [#allocation4], 4294967168 }
0x12e5   :  { %1737 = vsyncpa [#allocation3], 1 }
0x12e6   :  { %1738 = vsyncpa [#allocation6], 1 }
0x12e7   :  { %1739 = vsyncpa [#allocation4], 1 }

</bundles_post_ra>
